<compile_context>
chip_gen: v7x
topology: tpu7x:2x2x1
jax: 0.10.0
libtpu: 0.0.40
codegen_flags: <defaults>
</compile_context>

<pallas_src>
import numpy as np

import jax
import jax.numpy as jnp
from jax.experimental import pallas as pl
from jax.experimental.pallas import tpu as pltpu


# ------------------------------- fused kernel ------------------------------- #

def _zero_border(ref, r0, nrows, c0, ncols):
    """Zero everything in ref (shape (n, R, L)) EXCEPT rows [r0, r0+nrows) x lanes
    [c0, c0+ncols): the 1-px conv border plus any asymmetric F.pad margins.  At most
    4 bulk stores instead of re-writing the whole slab."""
    n, R, L = ref.shape
    if r0 > 0:
        ref[:, 0:r0, :] = jnp.zeros((n, r0, L), jnp.float32)
    if r0 + nrows < R:
        ref[:, r0 + nrows:R, :] = jnp.zeros((n, R - r0 - nrows, L), jnp.float32)
    if c0 > 0:
        ref[:, r0:r0 + nrows, 0:c0] = jnp.zeros((n, nrows, c0), jnp.float32)
    if c0 + ncols < L:
        ref[:, r0:r0 + nrows, c0 + ncols:L] = jnp.zeros((n, nrows, L - c0 - ncols),
                                                        jnp.float32)


def upconv_fused_kernel(x1_ref, x2_ref, ryblk_ref, g_ref, bup_ref,
                        wb1s_ref, wb1u_ref, b1_ref, ga1_ref, be1_ref,
                        wb2_ref, b2_ref, ga2_ref, be2_ref,
                        cfold_ref, cbcast_ref,
                        out_ref,
                        pad_s_ref, pad_u_ref, pad2_ref):
    f32 = jnp.float32
    N, Hs, _ = x2_ref.shape
    Cout = ga1_ref.shape[1]
    Ws = out_ref.shape[1] // Cout
    Cskip = x2_ref.shape[2] // Ws
    Hup = x1_ref.shape[0] // N                      # spatial size of up(x1)
    Wup = g_ref.shape[2] // Cout
    rows = N * Hs
    py0 = (Hs - Hup) // 2                           # F.pad near-side offsets (diff // 2)
    px0 = (Ws - Wup) // 2

    # ---- up path: bilinear-2x (align_corners=True) + Conv2d(k=2, s=2), host-folded
    #      into 2 matmuls per row parity, batched over N via a block-diag row operator.
    x1 = x1_ref[...]                                            # (N*H1, W1*C1)
    up = (jnp.dot(ryblk_ref[0],
                  jnp.dot(x1, g_ref[0], preferred_element_type=f32),
                  preferred_element_type=f32)
          + jnp.dot(ryblk_ref[1],
                    jnp.dot(x1, g_ref[1], preferred_element_type=f32),
                    preferred_element_type=f32)
          + bup_ref[...])                                       # (N*Hup, Wup*Cout)

    # ---- padded, lane-fused conv-1 inputs.  Two separate streams realize
    #      torch.cat([x2, up], dim=1); interiors are single bulk stores, only the
    #      border / F.pad margins get zeroed. ----
    _zero_border(pad_s_ref, 1, Hs, Cskip, Ws * Cskip)
    pad_s_ref[:, 1:Hs + 1, Cskip:(Ws + 1) * Cskip] = x2_ref[...]

    _zero_border(pad_u_ref, 1 + py0, Hup, (1 + px0) * Cout, Wup * Cout)
    pad_u_ref[:, 1 + py0:1 + py0 + Hup, (1 + px0) * Cout:(1 + px0 + Wup) * Cout] = (
        up.reshape(N, Hup, Wup * Cout))

    # ---- shared helpers ----
    def conv_banded(pad_ref, wband_ref):
        # 3x3 conv as 3 matmuls: LHS = lane-fused padded row slab (N*Hs, (Ws+2)*C),
        # RHS = host-built block-banded weights ((Ws+2)*C, Ws*Cout).  No im2col scratch.
        acc = None
        for dy in range(3):
            lhs = pad_ref[:, dy:dy + Hs, :].reshape(rows, pad_ref.shape[2])
            t = jnp.dot(lhs, wband_ref[dy], preferred_element_type=f32)
            acc = t if acc is None else acc + t
        return acc                                              # (N*Hs, Ws*Cout)

    inv_cnt = 1.0 / float(rows * Ws)

    def bn_relu(y, gamma_ref, beta_ref):
        # training-mode BatchNorm: lane-dense (rows, Ws*Cout) reductions, then a tiny
        # matmul folds the per-W partials to per-channel stats (and broadcasts back).
        s1 = jnp.sum(y, axis=0, keepdims=True)                  # (1, Ws*Cout)
        s2 = jnp.sum(y * y, axis=0, keepdims=True)
        mean = jnp.dot(s1, cfold_ref[...], preferred_element_type=f32) * inv_cnt  # (1,Cout)
        ex2 = jnp.dot(s2, cfold_ref[...], preferred_element_type=f32) * inv_cnt
        var = jnp.maximum(ex2 - mean * mean, 0.0)               # clamp one-pass cancellation
        scale = gamma_ref[...] * jax.lax.rsqrt(var + 1e-5)      # (1, Cout)
        shift = beta_ref[...] - mean * scale
        scale_l = jnp.dot(scale, cbcast_ref[...], preferred_element_type=f32)  # (1, Ws*Cout)
        shift_l = jnp.dot(shift, cbcast_ref[...], preferred_element_type=f32)
        return jnp.maximum(y * scale_l + shift_l, 0.0)

    # ---- conv1 (skip-stream + up-stream banded matmuls) -> BN -> ReLU ----
    y1 = conv_banded(pad_s_ref, wb1s_ref) + conv_banded(pad_u_ref, wb1u_ref) + b1_ref[...]
    y1 = bn_relu(y1, ga1_ref, be1_ref)                          # (N*Hs, Ws*Cout)

    # ---- conv2 -> BN -> ReLU ----
    _zero_border(pad2_ref, 1, Hs, Cout, Ws * Cout)
    pad2_ref[:, 1:Hs + 1, Cout:(Ws + 1) * Cout] = y1.reshape(N, Hs, Ws * Cout)
    y2 = bn_relu(conv_banded(pad2_ref, wb2_ref) + b2_ref[...], ga2_ref, be2_ref)

    out_ref[...] = y2                                           # lane-dense output slab


# ------------------------------ host-side glue ------------------------------ #

def _upsample_matrix(n_in, n_out):
    """Row operator of nn.Upsample(scale_factor=2, mode='bilinear', align_corners=True)."""
    r = np.zeros((n_out, n_in), np.float32)
    for i in range(n_out):
        src = i * (n_in - 1) / (n_out - 1) if n_out > 1 else 0.0
        i0 = min(int(np.floor(src)), n_in - 1)
        f = src - i0
        r[i, i0] += 1.0 - f
        if f > 0.0 and i0 + 1 < n_in:
            r[i, i0 + 1] += f
    return r


def _banded_conv3_weights(w_oihw, ws):
    """Fold the W dimension of a 3x3/pad=1 conv into block-banded matmul weights.

    Returns (3, (ws+2)*Cin, ws*Cout) with
        out[dy, (j+dx)*Cin + ci, j*Cout + co] = w[co, ci, dy, dx].
    """
    co_, ci_ = w_oihw.shape[0], w_oihw.shape[1]
    out = np.zeros((3, (ws + 2) * ci_, ws * co_), np.float32)
    for dy in range(3):
        wt = np.transpose(w_oihw[:, :, dy, :], (1, 0, 2))       # (ci, co, dx)
        for j in range(ws):
            for dx in range(3):
                out[dy, (j + dx) * ci_:(j + dx + 1) * ci_,
                    j * co_:(j + 1) * co_] = wt[:, :, dx]
    return out


def prepare_params(raw, n, h1, w1, hs, ws):
    """Fold PyTorch-shaped parameters into the operators the fused kernel consumes."""
    w_up = np.asarray(raw["w_up"], np.float32)                  # (out_c, in_c, 2, 2)
    out_c, in_c = w_up.shape[0], w_up.shape[1]
    cskip = np.asarray(raw["w1"]).shape[1] - out_c              # skip channels in concat

    # --- up path folding: Upsample(bilinear, align_corners) + Conv2d(k=2, s=2) ---
    ry = _upsample_matrix(h1, 2 * h1)                           # (2*h1, h1)
    rx = _upsample_matrix(w1, 2 * w1)
    ry_par = [ry[0::2], ry[1::2]]                               # per output-row parity
    rx_par = [rx[0::2], rx[1::2]]
    wc = np.transpose(w_up, (2, 3, 1, 0))                       # (dy, dx, ci, co)

    def fold(dy):
        # G_dy[w*in_c + ci, j*out_c + co] = sum_dx Rx[2j+dx, w] * w_up[co, ci, dy, dx]
        g = (np.einsum('jw,io->wijo', rx_par[0], wc[dy, 0])
             + np.einsum('jw,io->wijo', rx_par[1], wc[dy, 1]))
        return g.reshape(w1 * in_c, w1 * out_c)

    g = np.stack([fold(0), fold(1)]).astype(np.float32)
    # block-diagonal row operator -> one matmul per parity covers the whole batch
    ryblk = np.stack([np.kron(np.eye(n, dtype=np.float32), ry_par[d]) for d in (0, 1)])

    # --- 3x3 convs as block-banded weights; conv1 split into skip / up streams (= concat)
    w1_np = np.asarray(raw["w1"], np.float32)                   # (out_c, cskip+out_c, 3, 3)
    w2_np = np.asarray(raw["w2"], np.float32)                   # (out_c, out_c, 3, 3)

    # --- BN / bias vectors and the W<->channel fold/broadcast matrices ---
    cfold = np.kron(np.ones((ws, 1), np.float32),
                    np.eye(out_c, dtype=np.float32))            # (ws*out_c, out_c)

    def as2d(v):
        return jnp.asarray(np.asarray(v, np.float32).reshape(1, -1))

    return {
        "ryblk": jnp.asarray(ryblk.astype(np.float32)),
        "g": jnp.asarray(g),
        "bup": jnp.asarray(np.tile(np.asarray(raw["b_up"], np.float32), w1).reshape(1, -1)),
        "wb1s": jnp.asarray(_banded_conv3_weights(w1_np[:, :cskip], ws)),
        "wb1u": jnp.asarray(_banded_conv3_weights(w1_np[:, cskip:], ws)),
        "wb2": jnp.asarray(_banded_conv3_weights(w2_np, ws)),
        "b1": jnp.asarray(np.tile(np.asarray(raw["b1"], np.float32), ws).reshape(1, -1)),
        "b2": jnp.asarray(np.tile(np.asarray(raw["b2"], np.float32), ws).reshape(1, -1)),
        "ga1": as2d(raw["g1"]), "be1": as2d(raw["bt1"]),
        "ga2": as2d(raw["g2"]), "be2": as2d(raw["bt2"]),
        "cfold": jnp.asarray(cfold), "cbcast": jnp.asarray(np.ascontiguousarray(cfold.T)),
    }


@jax.jit
def upconv_forward(x1_nchw, x2_nchw, p):
    n, c1, h1, w1 = x1_nchw.shape
    _, cskip, hs, ws = x2_nchw.shape
    out_c = p["ga1"].shape[1]

    # layout plumbing (tiny tensors, host side): NCHW -> lane-fused slabs for the kernel.
    x1f = jnp.transpose(x1_nchw, (0, 2, 3, 1)).reshape(n * h1, w1 * c1)
    x2f = jnp.transpose(x2_nchw, (0, 2, 3, 1)).reshape(n, hs, ws * cskip)

    args = [x1f, x2f, p["ryblk"], p["g"], p["bup"],
            p["wb1s"], p["wb1u"], p["b1"], p["ga1"], p["be1"],
            p["wb2"], p["b2"], p["ga2"], p["be2"],
            p["cfold"], p["cbcast"]]

    def full_spec(a):
        nd = a.ndim
        return pl.BlockSpec(a.shape, lambda i, _nd=nd: (0,) * _nd)

    out2d = pl.pallas_call(
        upconv_fused_kernel,
        out_shape=jax.ShapeDtypeStruct((n * hs, ws * out_c), jnp.float32),
        # Single grid step over the whole (small) batch: training-mode BatchNorm needs
        # batch-wide statistics, and everything comfortably fits in VMEM at these sizes.
        grid=(1,),
        in_specs=[full_spec(a) for a in args],
        out_specs=pl.BlockSpec((n * hs, ws * out_c), lambda i: (0, 0)),
        scratch_shapes=[
            pltpu.VMEM((n, hs + 2, (ws + 2) * cskip), jnp.float32),   # padded skip stream
            pltpu.VMEM((n, hs + 2, (ws + 2) * out_c), jnp.float32),   # padded up stream
            pltpu.VMEM((n, hs + 2, (ws + 2) * out_c), jnp.float32),   # padded conv2 input
        ],
        compiler_params=pltpu.CompilerParams(
            dimension_semantics=("arbitrary",),
            vmem_limit_bytes=64 * 1024 * 1024),
    )(*args)
    # lane-dense kernel output -> NCHW (host-side layout plumbing only)
    return jnp.transpose(out2d.reshape(n, hs, ws, out_c), (0, 3, 1, 2))


# ---------------------------- pure-JAX reference ----------------------------- #

def reference_forward(x1, x2, raw):
    """Independent XLA reference with PyTorch UpConv semantics (NCHW throughout)."""
    def up2(x):  # bilinear, scale 2, align_corners=True
        _, _, h, w = x.shape

        def coef(n_in):
            n_out = 2 * n_in
            t = jnp.arange(n_out, dtype=jnp.float32) * (n_in - 1) / (n_out - 1)
            i0 = jnp.clip(jnp.floor(t).astype(jnp.int32), 0, n_in - 1)
            i1 = jnp.minimum(i0 + 1, n_in - 1)
            return i0, i1, t - i0.astype(jnp.float32)

        y0, y1i, fy = coef(h)
        x0, x1i, fx = coef(w)
        xh = (x[:, :, y0, :] * (1.0 - fy)[None, None, :, None]
              + x[:, :, y1i, :] * fy[None, None, :, None])
        return (xh[:, :, :, x0] * (1.0 - fx)[None, None, None, :]
                + xh[:, :, :, x1i] * fx[None, None, None, :])

    def conv(x, w, b, stride, pad):
        y = jax.lax.conv_general_dilated(
            x, w, window_strides=(stride, stride), padding=((pad, pad), (pad, pad)),
            dimension_numbers=("NCHW", "OIHW", "NCHW"))
        return y + b[None, :, None, None]

    def bn_relu(x, g, bt):
        m = jnp.mean(x, axis=(0, 2, 3), keepdims=True)
        v = jnp.mean((x - m) ** 2, axis=(0, 2, 3), keepdims=True)
        y = (x - m) * jax.lax.rsqrt(v + 1e-5) * g[None, :, None, None] + bt[None, :, None, None]
        return jnp.maximum(y, 0.0)

    u = conv(up2(x1), raw["w_up"], raw["b_up"], stride=2, pad=0)
    dy = x2.shape[2] - u.shape[2]
    dx = x2.shape[3] - u.shape[3]
    u = jnp.pad(u, ((0, 0), (0, 0), (dy // 2, dy - dy // 2), (dx // 2, dx - dx // 2)))
    x = jnp.concatenate([x2, u], axis=1)
    x = bn_relu(conv(x, raw["w1"], raw["b1"], 1, 1), raw["g1"], raw["bt1"])
    x = bn_relu(conv(x, raw["w2"], raw["b2"], 1, 1), raw["g2"], raw["bt2"])
    return x


# ----------------------------------- main ----------------------------------- #

if __name__ == "__main__":
    in_channels, out_channels = 8, 4
    N, H, W = 2, 16, 16      # x1 spatial; the skip tensor x2 has matching spatial size

    key = jax.random.PRNGKey(0)
    ks = jax.random.split(key, 12)
    x1 = jax.random.normal(ks[0], (N, in_channels, H, W), jnp.float32)
    x2 = jax.random.normal(ks[1], (N, in_channels - out_channels, H, W), jnp.float32)

    # PyTorch-shaped parameters.
    raw = {
        "w_up": 0.1 * jax.random.normal(ks[2], (out_channels, in_channels, 2, 2), jnp.float32),
        "b_up": 0.1 * jax.random.normal(ks[3], (out_channels,), jnp.float32),
        "w1": 0.1 * jax.random.normal(ks[4], (out_channels, in_channels, 3, 3), jnp.float32),
        "b1": 0.1 * jax.random.normal(ks[5], (out_channels,), jnp.float32),
        "w2": 0.1 * jax.random.normal(ks[6], (out_channels, out_channels, 3, 3), jnp.float32),
        "b2": 0.1 * jax.random.normal(ks[7], (out_channels,), jnp.float32),
        "g1": 1.0 + 0.1 * jax.random.normal(ks[8], (out_channels,), jnp.float32),
        "bt1": 0.1 * jax.random.normal(ks[9], (out_channels,), jnp.float32),
        "g2": 1.0 + 0.1 * jax.random.normal(ks[10], (out_channels,), jnp.float32),
        "bt2": 0.1 * jax.random.normal(ks[11], (out_channels,), jnp.float32),
    }

    params = prepare_params(raw, N, H, W, H, W)
    out = jax.block_until_ready(upconv_forward(x1, x2, params))
    assert out.shape == (N, out_channels, H, W), out.shape

    ref = jax.block_until_ready(reference_forward(x1, x2, raw))
    err = float(jnp.max(jnp.abs(out - ref)))
    assert jnp.allclose(out, ref, atol=1e-3, rtol=1e-3), f"max abs err = {err}"

    print("KERNEL_OK")
</pallas_src>

<mosaic_0001>
module attributes {stable_mosaic.version = 11 : i64} {
  func.func @upconv_fused_kernel(%arg0: i32, %arg1: memref<32x128xf32, #tpu.memory_space<vmem>>, %arg2: memref<2x16x64xf32, #tpu.memory_space<vmem>>, %arg3: memref<2x32x32xf32, #tpu.memory_space<vmem>>, %arg4: memref<2x128x64xf32, #tpu.memory_space<vmem>>, %arg5: memref<1x64xf32, #tpu.memory_space<vmem>>, %arg6: memref<3x72x64xf32, #tpu.memory_space<vmem>>, %arg7: memref<3x72x64xf32, #tpu.memory_space<vmem>>, %arg8: memref<1x64xf32, #tpu.memory_space<vmem>>, %arg9: memref<1x4xf32, #tpu.memory_space<vmem>>, %arg10: memref<1x4xf32, #tpu.memory_space<vmem>>, %arg11: memref<3x72x64xf32, #tpu.memory_space<vmem>>, %arg12: memref<1x64xf32, #tpu.memory_space<vmem>>, %arg13: memref<1x4xf32, #tpu.memory_space<vmem>>, %arg14: memref<1x4xf32, #tpu.memory_space<vmem>>, %arg15: memref<64x4xf32, #tpu.memory_space<vmem>>, %arg16: memref<4x64xf32, #tpu.memory_space<vmem>>, %arg17: memref<32x64xf32, #tpu.memory_space<vmem>>, %arg18: memref<2x18x72xf32, #tpu.memory_space<vmem>>, %arg19: memref<2x18x72xf32, #tpu.memory_space<vmem>>, %arg20: memref<2x18x72xf32, #tpu.memory_space<vmem>>) attributes {dimension_semantics = [#tpu.dimension_semantics<arbitrary>], iteration_bounds = array<i64: 1>, scalar_prefetch = 0 : i64, scratch_operands = 3 : i64, tpu.core_type = #tpu.core_type<tc>, window_params = [{pipeline_mode = #tpu.pipeline_mode<synchronous>, transform_indices = @transform_0, window_bounds = array<i64: 32, 128>}, {pipeline_mode = #tpu.pipeline_mode<synchronous>, transform_indices = @transform_1, window_bounds = array<i64: 2, 16, 64>}, {pipeline_mode = #tpu.pipeline_mode<synchronous>, transform_indices = @transform_2, window_bounds = array<i64: 2, 32, 32>}, {pipeline_mode = #tpu.pipeline_mode<synchronous>, transform_indices = @transform_3, window_bounds = array<i64: 2, 128, 64>}, {pipeline_mode = #tpu.pipeline_mode<synchronous>, transform_indices = @transform_4, window_bounds = array<i64: 1, 64>}, {pipeline_mode = #tpu.pipeline_mode<synchronous>, transform_indices = @transform_5, window_bounds = array<i64: 3, 72, 64>}, {pipeline_mode = #tpu.pipeline_mode<synchronous>, transform_indices = @transform_6, window_bounds = array<i64: 3, 72, 64>}, {pipeline_mode = #tpu.pipeline_mode<synchronous>, transform_indices = @transform_7, window_bounds = array<i64: 1, 64>}, {pipeline_mode = #tpu.pipeline_mode<synchronous>, transform_indices = @transform_8, window_bounds = array<i64: 1, 4>}, {pipeline_mode = #tpu.pipeline_mode<synchronous>, transform_indices = @transform_9, window_bounds = array<i64: 1, 4>}, {pipeline_mode = #tpu.pipeline_mode<synchronous>, transform_indices = @transform_10, window_bounds = array<i64: 3, 72, 64>}, {pipeline_mode = #tpu.pipeline_mode<synchronous>, transform_indices = @transform_11, window_bounds = array<i64: 1, 64>}, {pipeline_mode = #tpu.pipeline_mode<synchronous>, transform_indices = @transform_12, window_bounds = array<i64: 1, 4>}, {pipeline_mode = #tpu.pipeline_mode<synchronous>, transform_indices = @transform_13, window_bounds = array<i64: 1, 4>}, {pipeline_mode = #tpu.pipeline_mode<synchronous>, transform_indices = @transform_14, window_bounds = array<i64: 64, 4>}, {pipeline_mode = #tpu.pipeline_mode<synchronous>, transform_indices = @transform_15, window_bounds = array<i64: 4, 64>}, {pipeline_mode = #tpu.pipeline_mode<synchronous>, transform_indices = @transform_16, window_bounds = array<i64: 32, 64>}]} {
    %c0 = arith.constant 0 : index
    %c0_0 = arith.constant 0 : index
    %0 = vector.load %arg1[%c0, %c0_0] : memref<32x128xf32, #tpu.memory_space<vmem>>, vector<32x128xf32>
    %c0_1 = arith.constant 0 : index
    %c0_2 = arith.constant 0 : index
    %c0_3 = arith.constant 0 : index
    %1 = vector.load %arg3[%c0_1, %c0_2, %c0_3] : memref<2x32x32xf32, #tpu.memory_space<vmem>>, vector<1x32x32xf32>
    %2 = vector.shape_cast %1 : vector<1x32x32xf32> to vector<32x32xf32>
    %c0_4 = arith.constant 0 : index
    %c0_5 = arith.constant 0 : index
    %c0_6 = arith.constant 0 : index
    %3 = vector.load %arg4[%c0_4, %c0_5, %c0_6] : memref<2x128x64xf32, #tpu.memory_space<vmem>>, vector<1x128x64xf32>
    %4 = vector.shape_cast %3 : vector<1x128x64xf32> to vector<128x64xf32>
    %cst = arith.constant dense<0.000000e+00> : vector<32x64xf32>
    %5 = tpu.matmul %0, %4, %cst {dimension_numbers = #tpu.dot_dimension_numbers<[1], [0], [0], [1], [0, 0, 1, 1], [], []>} : vector<32x128xf32>, vector<128x64xf32>, vector<32x64xf32> -> vector<32x64xf32>
    %cst_7 = arith.constant dense<0.000000e+00> : vector<32x64xf32>
    %6 = tpu.matmul %2, %5, %cst_7 {dimension_numbers = #tpu.dot_dimension_numbers<[1], [0], [0], [1], [0, 0, 1, 1], [], []>} : vector<32x32xf32>, vector<32x64xf32>, vector<32x64xf32> -> vector<32x64xf32>
    %c1 = arith.constant 1 : index
    %c0_8 = arith.constant 0 : index
    %c0_9 = arith.constant 0 : index
    %7 = vector.load %arg3[%c1, %c0_8, %c0_9] : memref<2x32x32xf32, #tpu.memory_space<vmem>>, vector<1x32x32xf32>
    %8 = vector.shape_cast %7 : vector<1x32x32xf32> to vector<32x32xf32>
    %c1_10 = arith.constant 1 : index
    %c0_11 = arith.constant 0 : index
    %c0_12 = arith.constant 0 : index
    %9 = vector.load %arg4[%c1_10, %c0_11, %c0_12] : memref<2x128x64xf32, #tpu.memory_space<vmem>>, vector<1x128x64xf32>
    %10 = vector.shape_cast %9 : vector<1x128x64xf32> to vector<128x64xf32>
    %cst_13 = arith.constant dense<0.000000e+00> : vector<32x64xf32>
    %11 = tpu.matmul %0, %10, %cst_13 {dimension_numbers = #tpu.dot_dimension_numbers<[1], [0], [0], [1], [0, 0, 1, 1], [], []>} : vector<32x128xf32>, vector<128x64xf32>, vector<32x64xf32> -> vector<32x64xf32>
    %cst_14 = arith.constant dense<0.000000e+00> : vector<32x64xf32>
    %12 = tpu.matmul %8, %11, %cst_14 {dimension_numbers = #tpu.dot_dimension_numbers<[1], [0], [0], [1], [0, 0, 1, 1], [], []>} : vector<32x32xf32>, vector<32x64xf32>, vector<32x64xf32> -> vector<32x64xf32>
    %13 = arith.addf %6, %12 : vector<32x64xf32>
    %c0_15 = arith.constant 0 : index
    %c0_16 = arith.constant 0 : index
    %14 = vector.load %arg5[%c0_15, %c0_16] : memref<1x64xf32, #tpu.memory_space<vmem>>, vector<1x64xf32>
    %15 = vector.broadcast %14 : vector<1x64xf32> to vector<32x64xf32>
    %16 = arith.addf %13, %15 : vector<32x64xf32>
    %cst_17 = arith.constant 0.000000e+00 : f32
    %17 = vector.broadcast %cst_17 : f32 to vector<2x1x72xf32>
    %c0_18 = arith.constant 0 : index
    %c0_19 = arith.constant 0 : index
    %c0_20 = arith.constant 0 : index
    %18 = vector.load %arg18[%c0_18, %c0_19, %c0_20] : memref<2x18x72xf32, #tpu.memory_space<vmem>>, vector<2x1x72xf32>
    tpu.vector_store %arg18[%c0_18, %c0_19, %c0_20], %17 {strides = array<i32>} : memref<2x18x72xf32, #tpu.memory_space<vmem>>, vector<2x1x72xf32>,
    %cst_21 = arith.constant 0.000000e+00 : f32
    %19 = vector.broadcast %cst_21 : f32 to vector<2x1x72xf32>
    %c0_22 = arith.constant 0 : index
    %c17 = arith.constant 17 : index
    %c0_23 = arith.constant 0 : index
    %20 = vector.load %arg18[%c0_22, %c17, %c0_23] : memref<2x18x72xf32, #tpu.memory_space<vmem>>, vector<2x1x72xf32>
    tpu.vector_store %arg18[%c0_22, %c17, %c0_23], %19 {strides = array<i32>} : memref<2x18x72xf32, #tpu.memory_space<vmem>>, vector<2x1x72xf32>,
    %cst_24 = arith.constant 0.000000e+00 : f32
    %21 = vector.broadcast %cst_24 : f32 to vector<2x16x4xf32>
    %c0_25 = arith.constant 0 : index
    %c1_26 = arith.constant 1 : index
    %c0_27 = arith.constant 0 : index
    %22 = vector.load %arg18[%c0_25, %c1_26, %c0_27] : memref<2x18x72xf32, #tpu.memory_space<vmem>>, vector<2x16x4xf32>
    tpu.vector_store %arg18[%c0_25, %c1_26, %c0_27], %21 {strides = array<i32>} : memref<2x18x72xf32, #tpu.memory_space<vmem>>, vector<2x16x4xf32>,
    %cst_28 = arith.constant 0.000000e+00 : f32
    %23 = vector.broadcast %cst_28 : f32 to vector<2x16x4xf32>
    %c0_29 = arith.constant 0 : index
    %c1_30 = arith.constant 1 : index
    %c68 = arith.constant 68 : index
    %24 = vector.load %arg18[%c0_29, %c1_30, %c68] : memref<2x18x72xf32, #tpu.memory_space<vmem>>, vector<2x16x4xf32>
    tpu.vector_store %arg18[%c0_29, %c1_30, %c68], %23 {strides = array<i32>} : memref<2x18x72xf32, #tpu.memory_space<vmem>>, vector<2x16x4xf32>,
    %c0_31 = arith.constant 0 : index
    %c0_32 = arith.constant 0 : index
    %c0_33 = arith.constant 0 : index
    %25 = vector.load %arg2[%c0_31, %c0_32, %c0_33] : memref<2x16x64xf32, #tpu.memory_space<vmem>>, vector<2x16x64xf32>
    %c0_34 = arith.constant 0 : index
    %c1_35 = arith.constant 1 : index
    %c4 = arith.constant 4 : index
    %26 = vector.load %arg18[%c0_34, %c1_35, %c4] : memref<2x18x72xf32, #tpu.memory_space<vmem>>, vector<2x16x64xf32>
    tpu.vector_store %arg18[%c0_34, %c1_35, %c4], %25 {strides = array<i32>} : memref<2x18x72xf32, #tpu.memory_space<vmem>>, vector<2x16x64xf32>,
    %cst_36 = arith.constant 0.000000e+00 : f32
    %27 = vector.broadcast %cst_36 : f32 to vector<2x1x72xf32>
    %c0_37 = arith.constant 0 : index
    %c0_38 = arith.constant 0 : index
    %c0_39 = arith.constant 0 : index
    %28 = vector.load %arg19[%c0_37, %c0_38, %c0_39] : memref<2x18x72xf32, #tpu.memory_space<vmem>>, vector<2x1x72xf32>
    tpu.vector_store %arg19[%c0_37, %c0_38, %c0_39], %27 {strides = array<i32>} : memref<2x18x72xf32, #tpu.memory_space<vmem>>, vector<2x1x72xf32>,
    %cst_40 = arith.constant 0.000000e+00 : f32
    %29 = vector.broadcast %cst_40 : f32 to vector<2x1x72xf32>
    %c0_41 = arith.constant 0 : index
    %c17_42 = arith.constant 17 : index
    %c0_43 = arith.constant 0 : index
    %30 = vector.load %arg19[%c0_41, %c17_42, %c0_43] : memref<2x18x72xf32, #tpu.memory_space<vmem>>, vector<2x1x72xf32>
    tpu.vector_store %arg19[%c0_41, %c17_42, %c0_43], %29 {strides = array<i32>} : memref<2x18x72xf32, #tpu.memory_space<vmem>>, vector<2x1x72xf32>,
    %cst_44 = arith.constant 0.000000e+00 : f32
    %31 = vector.broadcast %cst_44 : f32 to vector<2x16x4xf32>
    %c0_45 = arith.constant 0 : index
    %c1_46 = arith.constant 1 : index
    %c0_47 = arith.constant 0 : index
    %32 = vector.load %arg19[%c0_45, %c1_46, %c0_47] : memref<2x18x72xf32, #tpu.memory_space<vmem>>, vector<2x16x4xf32>
    tpu.vector_store %arg19[%c0_45, %c1_46, %c0_47], %31 {strides = array<i32>} : memref<2x18x72xf32, #tpu.memory_space<vmem>>, vector<2x16x4xf32>,
    %cst_48 = arith.constant 0.000000e+00 : f32
    %33 = vector.broadcast %cst_48 : f32 to vector<2x16x4xf32>
    %c0_49 = arith.constant 0 : index
    %c1_50 = arith.constant 1 : index
    %c68_51 = arith.constant 68 : index
    %34 = vector.load %arg19[%c0_49, %c1_50, %c68_51] : memref<2x18x72xf32, #tpu.memory_space<vmem>>, vector<2x16x4xf32>
    tpu.vector_store %arg19[%c0_49, %c1_50, %c68_51], %33 {strides = array<i32>} : memref<2x18x72xf32, #tpu.memory_space<vmem>>, vector<2x16x4xf32>,
    %35 = vector.shape_cast %16 : vector<32x64xf32> to vector<2x16x64xf32>
    %c0_52 = arith.constant 0 : index
    %c1_53 = arith.constant 1 : index
    %c4_54 = arith.constant 4 : index
    %36 = vector.load %arg19[%c0_52, %c1_53, %c4_54] : memref<2x18x72xf32, #tpu.memory_space<vmem>>, vector<2x16x64xf32>
    tpu.vector_store %arg19[%c0_52, %c1_53, %c4_54], %35 {strides = array<i32>} : memref<2x18x72xf32, #tpu.memory_space<vmem>>, vector<2x16x64xf32>,
    %c0_55 = arith.constant 0 : index
    %c0_56 = arith.constant 0 : index
    %c0_57 = arith.constant 0 : index
    %37 = vector.load %arg18[%c0_55, %c0_56, %c0_57] : memref<2x18x72xf32, #tpu.memory_space<vmem>>, vector<2x16x72xf32>
    %38 = vector.shape_cast %37 : vector<2x16x72xf32> to vector<32x72xf32>
    %c0_58 = arith.constant 0 : index
    %c0_59 = arith.constant 0 : index
    %c0_60 = arith.constant 0 : index
    %39 = vector.load %arg6[%c0_58, %c0_59, %c0_60] : memref<3x72x64xf32, #tpu.memory_space<vmem>>, vector<1x72x64xf32>
    %40 = vector.shape_cast %39 : vector<1x72x64xf32> to vector<72x64xf32>
    %cst_61 = arith.constant dense<0.000000e+00> : vector<32x64xf32>
    %41 = tpu.matmul %38, %40, %cst_61 {dimension_numbers = #tpu.dot_dimension_numbers<[1], [0], [0], [1], [0, 0, 1, 1], [], []>} : vector<32x72xf32>, vector<72x64xf32>, vector<32x64xf32> -> vector<32x64xf32>
    %c0_62 = arith.constant 0 : index
    %c1_63 = arith.constant 1 : index
    %c0_64 = arith.constant 0 : index
    %42 = vector.load %arg18[%c0_62, %c1_63, %c0_64] : memref<2x18x72xf32, #tpu.memory_space<vmem>>, vector<2x16x72xf32>
    %43 = vector.shape_cast %42 : vector<2x16x72xf32> to vector<32x72xf32>
    %c1_65 = arith.constant 1 : index
    %c0_66 = arith.constant 0 : index
    %c0_67 = arith.constant 0 : index
    %44 = vector.load %arg6[%c1_65, %c0_66, %c0_67] : memref<3x72x64xf32, #tpu.memory_space<vmem>>, vector<1x72x64xf32>
    %45 = vector.shape_cast %44 : vector<1x72x64xf32> to vector<72x64xf32>
    %cst_68 = arith.constant dense<0.000000e+00> : vector<32x64xf32>
    %46 = tpu.matmul %43, %45, %cst_68 {dimension_numbers = #tpu.dot_dimension_numbers<[1], [0], [0], [1], [0, 0, 1, 1], [], []>} : vector<32x72xf32>, vector<72x64xf32>, vector<32x64xf32> -> vector<32x64xf32>
    %47 = arith.addf %41, %46 : vector<32x64xf32>
    %c0_69 = arith.constant 0 : index
    %c2 = arith.constant 2 : index
    %c0_70 = arith.constant 0 : index
    %48 = vector.load %arg18[%c0_69, %c2, %c0_70] : memref<2x18x72xf32, #tpu.memory_space<vmem>>, vector<2x16x72xf32>
    %49 = vector.shape_cast %48 : vector<2x16x72xf32> to vector<32x72xf32>
    %c2_71 = arith.constant 2 : index
    %c0_72 = arith.constant 0 : index
    %c0_73 = arith.constant 0 : index
    %50 = vector.load %arg6[%c2_71, %c0_72, %c0_73] : memref<3x72x64xf32, #tpu.memory_space<vmem>>, vector<1x72x64xf32>
    %51 = vector.shape_cast %50 : vector<1x72x64xf32> to vector<72x64xf32>
    %cst_74 = arith.constant dense<0.000000e+00> : vector<32x64xf32>
    %52 = tpu.matmul %49, %51, %cst_74 {dimension_numbers = #tpu.dot_dimension_numbers<[1], [0], [0], [1], [0, 0, 1, 1], [], []>} : vector<32x72xf32>, vector<72x64xf32>, vector<32x64xf32> -> vector<32x64xf32>
    %53 = arith.addf %47, %52 : vector<32x64xf32>
    %c0_75 = arith.constant 0 : index
    %c0_76 = arith.constant 0 : index
    %c0_77 = arith.constant 0 : index
    %54 = vector.load %arg19[%c0_75, %c0_76, %c0_77] : memref<2x18x72xf32, #tpu.memory_space<vmem>>, vector<2x16x72xf32>
    %55 = vector.shape_cast %54 : vector<2x16x72xf32> to vector<32x72xf32>
    %c0_78 = arith.constant 0 : index
    %c0_79 = arith.constant 0 : index
    %c0_80 = arith.constant 0 : index
    %56 = vector.load %arg7[%c0_78, %c0_79, %c0_80] : memref<3x72x64xf32, #tpu.memory_space<vmem>>, vector<1x72x64xf32>
    %57 = vector.shape_cast %56 : vector<1x72x64xf32> to vector<72x64xf32>
    %cst_81 = arith.constant dense<0.000000e+00> : vector<32x64xf32>
    %58 = tpu.matmul %55, %57, %cst_81 {dimension_numbers = #tpu.dot_dimension_numbers<[1], [0], [0], [1], [0, 0, 1, 1], [], []>} : vector<32x72xf32>, vector<72x64xf32>, vector<32x64xf32> -> vector<32x64xf32>
    %c0_82 = arith.constant 0 : index
    %c1_83 = arith.constant 1 : index
    %c0_84 = arith.constant 0 : index
    %59 = vector.load %arg19[%c0_82, %c1_83, %c0_84] : memref<2x18x72xf32, #tpu.memory_space<vmem>>, vector<2x16x72xf32>
    %60 = vector.shape_cast %59 : vector<2x16x72xf32> to vector<32x72xf32>
    %c1_85 = arith.constant 1 : index
    %c0_86 = arith.constant 0 : index
    %c0_87 = arith.constant 0 : index
    %61 = vector.load %arg7[%c1_85, %c0_86, %c0_87] : memref<3x72x64xf32, #tpu.memory_space<vmem>>, vector<1x72x64xf32>
    %62 = vector.shape_cast %61 : vector<1x72x64xf32> to vector<72x64xf32>
    %cst_88 = arith.constant dense<0.000000e+00> : vector<32x64xf32>
    %63 = tpu.matmul %60, %62, %cst_88 {dimension_numbers = #tpu.dot_dimension_numbers<[1], [0], [0], [1], [0, 0, 1, 1], [], []>} : vector<32x72xf32>, vector<72x64xf32>, vector<32x64xf32> -> vector<32x64xf32>
    %64 = arith.addf %58, %63 : vector<32x64xf32>
    %c0_89 = arith.constant 0 : index
    %c2_90 = arith.constant 2 : index
    %c0_91 = arith.constant 0 : index
    %65 = vector.load %arg19[%c0_89, %c2_90, %c0_91] : memref<2x18x72xf32, #tpu.memory_space<vmem>>, vector<2x16x72xf32>
    %66 = vector.shape_cast %65 : vector<2x16x72xf32> to vector<32x72xf32>
    %c2_92 = arith.constant 2 : index
    %c0_93 = arith.constant 0 : index
    %c0_94 = arith.constant 0 : index
    %67 = vector.load %arg7[%c2_92, %c0_93, %c0_94] : memref<3x72x64xf32, #tpu.memory_space<vmem>>, vector<1x72x64xf32>
    %68 = vector.shape_cast %67 : vector<1x72x64xf32> to vector<72x64xf32>
    %cst_95 = arith.constant dense<0.000000e+00> : vector<32x64xf32>
    %69 = tpu.matmul %66, %68, %cst_95 {dimension_numbers = #tpu.dot_dimension_numbers<[1], [0], [0], [1], [0, 0, 1, 1], [], []>} : vector<32x72xf32>, vector<72x64xf32>, vector<32x64xf32> -> vector<32x64xf32>
    %70 = arith.addf %64, %69 : vector<32x64xf32>
    %71 = arith.addf %53, %70 : vector<32x64xf32>
    %c0_96 = arith.constant 0 : index
    %c0_97 = arith.constant 0 : index
    %72 = vector.load %arg8[%c0_96, %c0_97] : memref<1x64xf32, #tpu.memory_space<vmem>>, vector<1x64xf32>
    %73 = vector.broadcast %72 : vector<1x64xf32> to vector<32x64xf32>
    %74 = arith.addf %71, %73 : vector<32x64xf32>
    %cst_98 = arith.constant dense<0.000000e+00> : vector<64xf32>
    %75 = vector.multi_reduction <add>, %74, %cst_98 [0] : vector<32x64xf32> to vector<64xf32>
    %76 = vector.shape_cast %75 : vector<64xf32> to vector<1x64xf32>
    %77 = arith.mulf %74, %74 : vector<32x64xf32>
    %cst_99 = arith.constant dense<0.000000e+00> : vector<64xf32>
    %78 = vector.multi_reduction <add>, %77, %cst_99 [0] : vector<32x64xf32> to vector<64xf32>
    %79 = vector.shape_cast %78 : vector<64xf32> to vector<1x64xf32>
    %c0_100 = arith.constant 0 : index
    %c0_101 = arith.constant 0 : index
    %80 = vector.load %arg15[%c0_100, %c0_101] : memref<64x4xf32, #tpu.memory_space<vmem>>, vector<64x4xf32>
    %cst_102 = arith.constant dense<0.000000e+00> : vector<1x4xf32>
    %81 = tpu.matmul %76, %80, %cst_102 {dimension_numbers = #tpu.dot_dimension_numbers<[1], [0], [0], [1], [0, 0, 1, 1], [], []>} : vector<1x64xf32>, vector<64x4xf32>, vector<1x4xf32> -> vector<1x4xf32>
    %cst_103 = arith.constant 0.001953125 : f32
    %82 = vector.broadcast %cst_103 : f32 to vector<1x4xf32>
    %83 = arith.mulf %81, %82 : vector<1x4xf32>
    %c0_104 = arith.constant 0 : index
    %c0_105 = arith.constant 0 : index
    %84 = vector.load %arg15[%c0_104, %c0_105] : memref<64x4xf32, #tpu.memory_space<vmem>>, vector<64x4xf32>
    %cst_106 = arith.constant dense<0.000000e+00> : vector<1x4xf32>
    %85 = tpu.matmul %79, %84, %cst_106 {dimension_numbers = #tpu.dot_dimension_numbers<[1], [0], [0], [1], [0, 0, 1, 1], [], []>} : vector<1x64xf32>, vector<64x4xf32>, vector<1x4xf32> -> vector<1x4xf32>
    %cst_107 = arith.constant 0.001953125 : f32
    %86 = vector.broadcast %cst_107 : f32 to vector<1x4xf32>
    %87 = arith.mulf %85, %86 : vector<1x4xf32>
    %88 = arith.mulf %83, %83 : vector<1x4xf32>
    %89 = arith.subf %87, %88 : vector<1x4xf32>
    %cst_108 = arith.constant 0.000000e+00 : f32
    %90 = vector.broadcast %cst_108 : f32 to vector<1x4xf32>
    %91 = arith.maximumf %89, %90 : vector<1x4xf32>
    %c0_109 = arith.constant 0 : index
    %c0_110 = arith.constant 0 : index
    %92 = vector.load %arg9[%c0_109, %c0_110] : memref<1x4xf32, #tpu.memory_space<vmem>>, vector<1x4xf32>
    %cst_111 = arith.constant 9.99999974E-6 : f32
    %93 = vector.broadcast %cst_111 : f32 to vector<1x4xf32>
    %94 = arith.addf %91, %93 : vector<1x4xf32>
    %95 = math.rsqrt %94 : vector<1x4xf32>
    %96 = arith.mulf %92, %95 : vector<1x4xf32>
    %c0_112 = arith.constant 0 : index
    %c0_113 = arith.constant 0 : index
    %97 = vector.load %arg10[%c0_112, %c0_113] : memref<1x4xf32, #tpu.memory_space<vmem>>, vector<1x4xf32>
    %98 = arith.mulf %83, %96 : vector<1x4xf32>
    %99 = arith.subf %97, %98 : vector<1x4xf32>
    %c0_114 = arith.constant 0 : index
    %c0_115 = arith.constant 0 : index
    %100 = vector.load %arg16[%c0_114, %c0_115] : memref<4x64xf32, #tpu.memory_space<vmem>>, vector<4x64xf32>
    %cst_116 = arith.constant dense<0.000000e+00> : vector<1x64xf32>
    %101 = tpu.matmul %96, %100, %cst_116 {dimension_numbers = #tpu.dot_dimension_numbers<[1], [0], [0], [1], [0, 0, 1, 1], [], []>} : vector<1x4xf32>, vector<4x64xf32>, vector<1x64xf32> -> vector<1x64xf32>
    %c0_117 = arith.constant 0 : index
    %c0_118 = arith.constant 0 : index
    %102 = vector.load %arg16[%c0_117, %c0_118] : memref<4x64xf32, #tpu.memory_space<vmem>>, vector<4x64xf32>
    %cst_119 = arith.constant dense<0.000000e+00> : vector<1x64xf32>
    %103 = tpu.matmul %99, %102, %cst_119 {dimension_numbers = #tpu.dot_dimension_numbers<[1], [0], [0], [1], [0, 0, 1, 1], [], []>} : vector<1x4xf32>, vector<4x64xf32>, vector<1x64xf32> -> vector<1x64xf32>
    %104 = vector.broadcast %101 : vector<1x64xf32> to vector<32x64xf32>
    %105 = arith.mulf %74, %104 : vector<32x64xf32>
    %106 = vector.broadcast %103 : vector<1x64xf32> to vector<32x64xf32>
    %107 = arith.addf %105, %106 : vector<32x64xf32>
    %cst_120 = arith.constant 0.000000e+00 : f32
    %108 = vector.broadcast %cst_120 : f32 to vector<32x64xf32>
    %109 = arith.maximumf %107, %108 : vector<32x64xf32>
    %cst_121 = arith.constant 0.000000e+00 : f32
    %110 = vector.broadcast %cst_121 : f32 to vector<2x1x72xf32>
    %c0_122 = arith.constant 0 : index
    %c0_123 = arith.constant 0 : index
    %c0_124 = arith.constant 0 : index
    %111 = vector.load %arg20[%c0_122, %c0_123, %c0_124] : memref<2x18x72xf32, #tpu.memory_space<vmem>>, vector<2x1x72xf32>
    tpu.vector_store %arg20[%c0_122, %c0_123, %c0_124], %110 {strides = array<i32>} : memref<2x18x72xf32, #tpu.memory_space<vmem>>, vector<2x1x72xf32>,
    %cst_125 = arith.constant 0.000000e+00 : f32
    %112 = vector.broadcast %cst_125 : f32 to vector<2x1x72xf32>
    %c0_126 = arith.constant 0 : index
    %c17_127 = arith.constant 17 : index
    %c0_128 = arith.constant 0 : index
    %113 = vector.load %arg20[%c0_126, %c17_127, %c0_128] : memref<2x18x72xf32, #tpu.memory_space<vmem>>, vector<2x1x72xf32>
    tpu.vector_store %arg20[%c0_126, %c17_127, %c0_128], %112 {strides = array<i32>} : memref<2x18x72xf32, #tpu.memory_space<vmem>>, vector<2x1x72xf32>,
    %cst_129 = arith.constant 0.000000e+00 : f32
    %114 = vector.broadcast %cst_129 : f32 to vector<2x16x4xf32>
    %c0_130 = arith.constant 0 : index
    %c1_131 = arith.constant 1 : index
    %c0_132 = arith.constant 0 : index
    %115 = vector.load %arg20[%c0_130, %c1_131, %c0_132] : memref<2x18x72xf32, #tpu.memory_space<vmem>>, vector<2x16x4xf32>
    tpu.vector_store %arg20[%c0_130, %c1_131, %c0_132], %114 {strides = array<i32>} : memref<2x18x72xf32, #tpu.memory_space<vmem>>, vector<2x16x4xf32>,
    %cst_133 = arith.constant 0.000000e+00 : f32
    %116 = vector.broadcast %cst_133 : f32 to vector<2x16x4xf32>
    %c0_134 = arith.constant 0 : index
    %c1_135 = arith.constant 1 : index
    %c68_136 = arith.constant 68 : index
    %117 = vector.load %arg20[%c0_134, %c1_135, %c68_136] : memref<2x18x72xf32, #tpu.memory_space<vmem>>, vector<2x16x4xf32>
    tpu.vector_store %arg20[%c0_134, %c1_135, %c68_136], %116 {strides = array<i32>} : memref<2x18x72xf32, #tpu.memory_space<vmem>>, vector<2x16x4xf32>,
    %118 = vector.shape_cast %109 : vector<32x64xf32> to vector<2x16x64xf32>
    %c0_137 = arith.constant 0 : index
    %c1_138 = arith.constant 1 : index
    %c4_139 = arith.constant 4 : index
    %119 = vector.load %arg20[%c0_137, %c1_138, %c4_139] : memref<2x18x72xf32, #tpu.memory_space<vmem>>, vector<2x16x64xf32>
    tpu.vector_store %arg20[%c0_137, %c1_138, %c4_139], %118 {strides = array<i32>} : memref<2x18x72xf32, #tpu.memory_space<vmem>>, vector<2x16x64xf32>,
    %c0_140 = arith.constant 0 : index
    %c0_141 = arith.constant 0 : index
    %c0_142 = arith.constant 0 : index
    %120 = vector.load %arg20[%c0_140, %c0_141, %c0_142] : memref<2x18x72xf32, #tpu.memory_space<vmem>>, vector<2x16x72xf32>
    %121 = vector.shape_cast %120 : vector<2x16x72xf32> to vector<32x72xf32>
    %c0_143 = arith.constant 0 : index
    %c0_144 = arith.constant 0 : index
    %c0_145 = arith.constant 0 : index
    %122 = vector.load %arg11[%c0_143, %c0_144, %c0_145] : memref<3x72x64xf32, #tpu.memory_space<vmem>>, vector<1x72x64xf32>
    %123 = vector.shape_cast %122 : vector<1x72x64xf32> to vector<72x64xf32>
    %cst_146 = arith.constant dense<0.000000e+00> : vector<32x64xf32>
    %124 = tpu.matmul %121, %123, %cst_146 {dimension_numbers = #tpu.dot_dimension_numbers<[1], [0], [0], [1], [0, 0, 1, 1], [], []>} : vector<32x72xf32>, vector<72x64xf32>, vector<32x64xf32> -> vector<32x64xf32>
    %c0_147 = arith.constant 0 : index
    %c1_148 = arith.constant 1 : index
    %c0_149 = arith.constant 0 : index
    %125 = vector.load %arg20[%c0_147, %c1_148, %c0_149] : memref<2x18x72xf32, #tpu.memory_space<vmem>>, vector<2x16x72xf32>
    %126 = vector.shape_cast %125 : vector<2x16x72xf32> to vector<32x72xf32>
    %c1_150 = arith.constant 1 : index
    %c0_151 = arith.constant 0 : index
    %c0_152 = arith.constant 0 : index
    %127 = vector.load %arg11[%c1_150, %c0_151, %c0_152] : memref<3x72x64xf32, #tpu.memory_space<vmem>>, vector<1x72x64xf32>
    %128 = vector.shape_cast %127 : vector<1x72x64xf32> to vector<72x64xf32>
    %cst_153 = arith.constant dense<0.000000e+00> : vector<32x64xf32>
    %129 = tpu.matmul %126, %128, %cst_153 {dimension_numbers = #tpu.dot_dimension_numbers<[1], [0], [0], [1], [0, 0, 1, 1], [], []>} : vector<32x72xf32>, vector<72x64xf32>, vector<32x64xf32> -> vector<32x64xf32>
    %130 = arith.addf %124, %129 : vector<32x64xf32>
    %c0_154 = arith.constant 0 : index
    %c2_155 = arith.constant 2 : index
    %c0_156 = arith.constant 0 : index
    %131 = vector.load %arg20[%c0_154, %c2_155, %c0_156] : memref<2x18x72xf32, #tpu.memory_space<vmem>>, vector<2x16x72xf32>
    %132 = vector.shape_cast %131 : vector<2x16x72xf32> to vector<32x72xf32>
    %c2_157 = arith.constant 2 : index
    %c0_158 = arith.constant 0 : index
    %c0_159 = arith.constant 0 : index
    %133 = vector.load %arg11[%c2_157, %c0_158, %c0_159] : memref<3x72x64xf32, #tpu.memory_space<vmem>>, vector<1x72x64xf32>
    %134 = vector.shape_cast %133 : vector<1x72x64xf32> to vector<72x64xf32>
    %cst_160 = arith.constant dense<0.000000e+00> : vector<32x64xf32>
    %135 = tpu.matmul %132, %134, %cst_160 {dimension_numbers = #tpu.dot_dimension_numbers<[1], [0], [0], [1], [0, 0, 1, 1], [], []>} : vector<32x72xf32>, vector<72x64xf32>, vector<32x64xf32> -> vector<32x64xf32>
    %136 = arith.addf %130, %135 : vector<32x64xf32>
    %c0_161 = arith.constant 0 : index
    %c0_162 = arith.constant 0 : index
    %137 = vector.load %arg12[%c0_161, %c0_162] : memref<1x64xf32, #tpu.memory_space<vmem>>, vector<1x64xf32>
    %138 = vector.broadcast %137 : vector<1x64xf32> to vector<32x64xf32>
    %139 = arith.addf %136, %138 : vector<32x64xf32>
    %cst_163 = arith.constant dense<0.000000e+00> : vector<64xf32>
    %140 = vector.multi_reduction <add>, %139, %cst_163 [0] : vector<32x64xf32> to vector<64xf32>
    %141 = vector.shape_cast %140 : vector<64xf32> to vector<1x64xf32>
    %142 = arith.mulf %139, %139 : vector<32x64xf32>
    %cst_164 = arith.constant dense<0.000000e+00> : vector<64xf32>
    %143 = vector.multi_reduction <add>, %142, %cst_164 [0] : vector<32x64xf32> to vector<64xf32>
    %144 = vector.shape_cast %143 : vector<64xf32> to vector<1x64xf32>
    %c0_165 = arith.constant 0 : index
    %c0_166 = arith.constant 0 : index
    %145 = vector.load %arg15[%c0_165, %c0_166] : memref<64x4xf32, #tpu.memory_space<vmem>>, vector<64x4xf32>
    %cst_167 = arith.constant dense<0.000000e+00> : vector<1x4xf32>
    %146 = tpu.matmul %141, %145, %cst_167 {dimension_numbers = #tpu.dot_dimension_numbers<[1], [0], [0], [1], [0, 0, 1, 1], [], []>} : vector<1x64xf32>, vector<64x4xf32>, vector<1x4xf32> -> vector<1x4xf32>
    %cst_168 = arith.constant 0.001953125 : f32
    %147 = vector.broadcast %cst_168 : f32 to vector<1x4xf32>
    %148 = arith.mulf %146, %147 : vector<1x4xf32>
    %c0_169 = arith.constant 0 : index
    %c0_170 = arith.constant 0 : index
    %149 = vector.load %arg15[%c0_169, %c0_170] : memref<64x4xf32, #tpu.memory_space<vmem>>, vector<64x4xf32>
    %cst_171 = arith.constant dense<0.000000e+00> : vector<1x4xf32>
    %150 = tpu.matmul %144, %149, %cst_171 {dimension_numbers = #tpu.dot_dimension_numbers<[1], [0], [0], [1], [0, 0, 1, 1], [], []>} : vector<1x64xf32>, vector<64x4xf32>, vector<1x4xf32> -> vector<1x4xf32>
    %cst_172 = arith.constant 0.001953125 : f32
    %151 = vector.broadcast %cst_172 : f32 to vector<1x4xf32>
    %152 = arith.mulf %150, %151 : vector<1x4xf32>
    %153 = arith.mulf %148, %148 : vector<1x4xf32>
    %154 = arith.subf %152, %153 : vector<1x4xf32>
    %cst_173 = arith.constant 0.000000e+00 : f32
    %155 = vector.broadcast %cst_173 : f32 to vector<1x4xf32>
    %156 = arith.maximumf %154, %155 : vector<1x4xf32>
    %c0_174 = arith.constant 0 : index
    %c0_175 = arith.constant 0 : index
    %157 = vector.load %arg13[%c0_174, %c0_175] : memref<1x4xf32, #tpu.memory_space<vmem>>, vector<1x4xf32>
    %cst_176 = arith.constant 9.99999974E-6 : f32
    %158 = vector.broadcast %cst_176 : f32 to vector<1x4xf32>
    %159 = arith.addf %156, %158 : vector<1x4xf32>
    %160 = math.rsqrt %159 : vector<1x4xf32>
    %161 = arith.mulf %157, %160 : vector<1x4xf32>
    %c0_177 = arith.constant 0 : index
    %c0_178 = arith.constant 0 : index
    %162 = vector.load %arg14[%c0_177, %c0_178] : memref<1x4xf32, #tpu.memory_space<vmem>>, vector<1x4xf32>
    %163 = arith.mulf %148, %161 : vector<1x4xf32>
    %164 = arith.subf %162, %163 : vector<1x4xf32>
    %c0_179 = arith.constant 0 : index
    %c0_180 = arith.constant 0 : index
    %165 = vector.load %arg16[%c0_179, %c0_180] : memref<4x64xf32, #tpu.memory_space<vmem>>, vector<4x64xf32>
    %cst_181 = arith.constant dense<0.000000e+00> : vector<1x64xf32>
    %166 = tpu.matmul %161, %165, %cst_181 {dimension_numbers = #tpu.dot_dimension_numbers<[1], [0], [0], [1], [0, 0, 1, 1], [], []>} : vector<1x4xf32>, vector<4x64xf32>, vector<1x64xf32> -> vector<1x64xf32>
    %c0_182 = arith.constant 0 : index
    %c0_183 = arith.constant 0 : index
    %167 = vector.load %arg16[%c0_182, %c0_183] : memref<4x64xf32, #tpu.memory_space<vmem>>, vector<4x64xf32>
    %cst_184 = arith.constant dense<0.000000e+00> : vector<1x64xf32>
    %168 = tpu.matmul %164, %167, %cst_184 {dimension_numbers = #tpu.dot_dimension_numbers<[1], [0], [0], [1], [0, 0, 1, 1], [], []>} : vector<1x4xf32>, vector<4x64xf32>, vector<1x64xf32> -> vector<1x64xf32>
    %169 = vector.broadcast %166 : vector<1x64xf32> to vector<32x64xf32>
    %170 = arith.mulf %139, %169 : vector<32x64xf32>
    %171 = vector.broadcast %168 : vector<1x64xf32> to vector<32x64xf32>
    %172 = arith.addf %170, %171 : vector<32x64xf32>
    %cst_185 = arith.constant 0.000000e+00 : f32
    %173 = vector.broadcast %cst_185 : f32 to vector<32x64xf32>
    %174 = arith.maximumf %172, %173 : vector<32x64xf32>
    %c0_186 = arith.constant 0 : index
    %c0_187 = arith.constant 0 : index
    %175 = vector.load %arg17[%c0_186, %c0_187] : memref<32x64xf32, #tpu.memory_space<vmem>>, vector<32x64xf32>
    tpu.vector_store %arg17[%c0_186, %c0_187], %174 {strides = array<i32>} : memref<32x64xf32, #tpu.memory_space<vmem>>, vector<32x64xf32>,
    return
  }
  func.func @transform_0(%arg0: i32) -> (i32, i32) {
    %c0_i32 = arith.constant 0 : i32
    %c0_i32_0 = arith.constant 0 : i32
    %c0_i32_1 = arith.constant 0 : i32
    return %c0_i32, %c0_i32_0 : i32, i32
  }
  func.func @transform_1(%arg0: i32) -> (i32, i32, i32) {
    %c0_i32 = arith.constant 0 : i32
    %c0_i32_0 = arith.constant 0 : i32
    %c0_i32_1 = arith.constant 0 : i32
    %c0_i32_2 = arith.constant 0 : i32
    return %c0_i32, %c0_i32_0, %c0_i32_1 : i32, i32, i32
  }
  func.func @transform_2(%arg0: i32) -> (i32, i32, i32) {
    %c0_i32 = arith.constant 0 : i32
    %c0_i32_0 = arith.constant 0 : i32
    %c0_i32_1 = arith.constant 0 : i32
    %c0_i32_2 = arith.constant 0 : i32
    return %c0_i32, %c0_i32_0, %c0_i32_1 : i32, i32, i32
  }
  func.func @transform_3(%arg0: i32) -> (i32, i32, i32) {
    %c0_i32 = arith.constant 0 : i32
    %c0_i32_0 = arith.constant 0 : i32
    %c0_i32_1 = arith.constant 0 : i32
    %c0_i32_2 = arith.constant 0 : i32
    return %c0_i32, %c0_i32_0, %c0_i32_1 : i32, i32, i32
  }
  func.func @transform_4(%arg0: i32) -> (i32, i32) {
    %c0_i32 = arith.constant 0 : i32
    %c0_i32_0 = arith.constant 0 : i32
    %c0_i32_1 = arith.constant 0 : i32
    return %c0_i32, %c0_i32_0 : i32, i32
  }
  func.func @transform_5(%arg0: i32) -> (i32, i32, i32) {
    %c0_i32 = arith.constant 0 : i32
    %c0_i32_0 = arith.constant 0 : i32
    %c0_i32_1 = arith.constant 0 : i32
    %c0_i32_2 = arith.constant 0 : i32
    return %c0_i32, %c0_i32_0, %c0_i32_1 : i32, i32, i32
  }
  func.func @transform_6(%arg0: i32) -> (i32, i32, i32) {
    %c0_i32 = arith.constant 0 : i32
    %c0_i32_0 = arith.constant 0 : i32
    %c0_i32_1 = arith.constant 0 : i32
    %c0_i32_2 = arith.constant 0 : i32
    return %c0_i32, %c0_i32_0, %c0_i32_1 : i32, i32, i32
  }
  func.func @transform_7(%arg0: i32) -> (i32, i32) {
    %c0_i32 = arith.constant 0 : i32
    %c0_i32_0 = arith.constant 0 : i32
    %c0_i32_1 = arith.constant 0 : i32
    return %c0_i32, %c0_i32_0 : i32, i32
  }
  func.func @transform_8(%arg0: i32) -> (i32, i32) {
    %c0_i32 = arith.constant 0 : i32
    %c0_i32_0 = arith.constant 0 : i32
    %c0_i32_1 = arith.constant 0 : i32
    return %c0_i32, %c0_i32_0 : i32, i32
  }
  func.func @transform_9(%arg0: i32) -> (i32, i32) {
    %c0_i32 = arith.constant 0 : i32
    %c0_i32_0 = arith.constant 0 : i32
    %c0_i32_1 = arith.constant 0 : i32
    return %c0_i32, %c0_i32_0 : i32, i32
  }
  func.func @transform_10(%arg0: i32) -> (i32, i32, i32) {
    %c0_i32 = arith.constant 0 : i32
    %c0_i32_0 = arith.constant 0 : i32
    %c0_i32_1 = arith.constant 0 : i32
    %c0_i32_2 = arith.constant 0 : i32
    return %c0_i32, %c0_i32_0, %c0_i32_1 : i32, i32, i32
  }
  func.func @transform_11(%arg0: i32) -> (i32, i32) {
    %c0_i32 = arith.constant 0 : i32
    %c0_i32_0 = arith.constant 0 : i32
    %c0_i32_1 = arith.constant 0 : i32
    return %c0_i32, %c0_i32_0 : i32, i32
  }
  func.func @transform_12(%arg0: i32) -> (i32, i32) {
    %c0_i32 = arith.constant 0 : i32
    %c0_i32_0 = arith.constant 0 : i32
    %c0_i32_1 = arith.constant 0 : i32
    return %c0_i32, %c0_i32_0 : i32, i32
  }
  func.func @transform_13(%arg0: i32) -> (i32, i32) {
    %c0_i32 = arith.constant 0 : i32
    %c0_i32_0 = arith.constant 0 : i32
    %c0_i32_1 = arith.constant 0 : i32
    return %c0_i32, %c0_i32_0 : i32, i32
  }
  func.func @transform_14(%arg0: i32) -> (i32, i32) {
    %c0_i32 = arith.constant 0 : i32
    %c0_i32_0 = arith.constant 0 : i32
    %c0_i32_1 = arith.constant 0 : i32
    return %c0_i32, %c0_i32_0 : i32, i32
  }
  func.func @transform_15(%arg0: i32) -> (i32, i32) {
    %c0_i32 = arith.constant 0 : i32
    %c0_i32_0 = arith.constant 0 : i32
    %c0_i32_1 = arith.constant 0 : i32
    return %c0_i32, %c0_i32_0 : i32, i32
  }
  func.func @transform_16(%arg0: i32) -> (i32, i32) {
    %c0_i32 = arith.constant 0 : i32
    %c0_i32_0 = arith.constant 0 : i32
    %c0_i32_1 = arith.constant 0 : i32
    return %c0_i32, %c0_i32_0 : i32, i32
  }
}

</mosaic_0001>

<bundles_post_ra>
// kernel: upconv_forward.1
= control target key start
LH: loop header
LB: loop body
LE: loop exit
PB: predicated region body
PF: predicated region fallthrough
CT: control target
= control target key end

     0   :  { %s4623_s0 = inlined_call_operand.hbm [shape: f32[32,128], index: 0, kind: input, shape index: {}]   ;;  %s4624_s1 = inlined_call_operand.hbm [shape: f32[2,16,64], index: 1, kind: input, shape index: {}]   ;;  %s4625_s2 = inlined_call_operand.hbm [shape: f32[2,32,32], index: 2, kind: input, shape index: {}]   ;;  %s4626_s3 = inlined_call_operand.hbm [shape: f32[2,128,64], index: 3, kind: input, shape index: {}]   ;;  %s4627_s4 = inlined_call_operand.hbm [shape: f32[1,64], index: 4, kind: input, shape index: {}]   ;;  %s4628_s5 = inlined_call_operand.hbm [shape: f32[3,72,64], index: 5, kind: input, shape index: {}]   ;;  %s4629_s6 = inlined_call_operand.hbm [shape: f32[3,72,64], index: 6, kind: input, shape index: {}]   ;;  %s4630_s7 = inlined_call_operand.hbm [shape: f32[1,64], index: 7, kind: input, shape index: {}]   ;;  %s4631_s8 = inlined_call_operand.hbm [shape: f32[1,4], index: 8, kind: input, shape index: {}]   ;;  %s4632_s9 = inlined_call_operand.hbm [shape: f32[1,4], index: 9, kind: input, shape index: {}]   ;;  %s4633_s10 = inlined_call_operand.hbm [shape: f32[3,72,64], index: 10, kind: input, shape index: {}]   ;;  %s4634_s11 = inlined_call_operand.hbm [shape: f32[1,64], index: 11, kind: input, shape index: {}]   ;;  %s4635_s12 = inlined_call_operand.hbm [shape: f32[1,4], index: 12, kind: input, shape index: {}]   ;;  %s4636_s13 = inlined_call_operand.hbm [shape: f32[1,4], index: 13, kind: input, shape index: {}]   ;;  %s4637_s14 = inlined_call_operand.hbm [shape: f32[64,4], index: 14, kind: input, shape index: {}]   ;;  %s4638_s15 = inlined_call_operand.hbm [shape: f32[4,64], index: 15, kind: input, shape index: {}]   ;;  %s4639_s16 = inlined_call_operand.hbm [shape: f32[32,64], index: 16, kind: output, shape index: {}]  }
   0x1   :  { %4641 = sst [smem:[#allocation42_spill]] %s4623_s0 }
   0x2   :  { %21 = vsyncpa [#allocation6], 0 }
   0x3   :  { %22 = vsyncpa [#allocation9], 0 }
   0x4   :  { %23 = vsyncpa [#allocation12], 0 }
   0x5   :  { %24 = vsyncpa [#allocation15], 0 }
   0x6   :  { %25 = vsyncpa [#allocation18], 0 }
   0x7   :  { %26 = vsyncpa [#allocation21], 0 }
   0x8   :  { %27 = vsyncpa [#allocation24], 0 }
   0x9   :  { %28 = vsyncpa [#allocation27], 0 }
   0xa   :  { %29 = vsyncpa [#allocation30], 0 }
   0xb   :  { %30 = vsyncpa [#allocation7], 0  ;;  %s3996_s21 = smov [#allocation8]   ;;  %s3997_s23 = smov [#allocation11]  }
   0xc   :  { %s48_s22 = sshll.u32 %s3996_s21, 4  ;;  %s72_s24 = sshll.u32 %s3997_s23, 4  ;;  %s49_s22 = int_to_ptr.vmem [resolvable:$true] %s48_s22  ;;  %s4104_s24 = int_to_ptr.vmem [resolvable:$true] %s72_s24 }
   0xd   :  { %s3602_s27 = scalar_lea.hbm %s4624_s1, 512 }
   0xe   :  { %p3603_p0 = scmp.ne.s32.totalorder %s4624_s1, %s3602_s27  ;;  %p3606_p1 = scmp.lt.u32.totalorder %s3602_s27, %s4624_s1 }
  0x10   :  { %p3608_p2 = pnand %p3606_p1, %p3603_p0 }
  0x12   :  { %3611 = shalt.err (!%p3608_p2)
}
  0x13   :  { %s3612_s17 = scalar_lea.vmem %s49_s22, 512  ;;  %p3617_p4 = scmp.lt.s32.totalorder %s49_s22, %s49_s22 }
  0x14   :  { %p3613_p3 = scmp.ne.s32.totalorder %s49_s22, %s3612_s17  ;;  %p3618_p5 = scmp.lt.s32.totalorder %s3612_s17, %s3612_s17 }
  0x16   :  { %p3619_p6 = por %p3618_p5, %p3617_p4 }
  0x18   :  { %p3620_p7 = pnand %p3619_p6, %p3613_p3 }
  0x1a   :  { %3623 = shalt.err (!%p3620_p7)
}
  0x1b   :  { %s3998_s18 = smov 128   ;;  %s3999_s19 = smov 8  }
  0x1c   :  { %54 = dma.hbm_to_vmem [thread:$0]  %s4624_s1, 512, %s49_s22, [#allocation9], %s3998_s18, %s3998_s18, %s3999_s19  }
  0x1d   :  { %s3624_s26 = scalar_lea.hbm %s4626_s3, 4096 }
  0x1e   :  { %p3625_p8 = scmp.ne.s32.totalorder %s4626_s3, %s3624_s26  ;;  %p3628_p9 = scmp.lt.u32.totalorder %s3624_s26, %s4626_s3 }
  0x20   :  { %p3630_p10 = pnand %p3628_p9, %p3625_p8 }
  0x22   :  { %3633 = shalt.err (!%p3630_p10)
}
  0x23   :  { %s3634_s0 = scalar_lea.vmem %s4104_s24, 4096  ;;  %p3639_p12 = scmp.lt.s32.totalorder %s4104_s24, %s4104_s24 }
  0x24   :  { %p3635_p11 = scmp.ne.s32.totalorder %s4104_s24, %s3634_s0  ;;  %p3640_p13 = scmp.lt.s32.totalorder %s3634_s0, %s3634_s0 }
  0x26   :  { %p3641_p0 = por %p3640_p13, %p3639_p12 }
  0x28   :  { %p3642_p1 = pnand %p3641_p0, %p3635_p11 }
  0x2a   :  { %3645 = shalt.err (!%p3642_p1)
}
  0x2b   :  { %78 = dma.hbm_to_vmem [thread:$0]  %s4626_s3, 4096, %s4104_s24, [#allocation12], %s3998_s18, %s3998_s18, %s3999_s19  }
  0x2c   :  { %s4000_s17 = smov [#allocation14]   ;;  %s4001_s21 = smov [#allocation17]  }
  0x2d   :  { %s94_s20 = sshll.u32 %s4000_s17, 4  ;;  %s119_s23 = sshll.u32 %s4001_s21, 4  ;;  %s95_s20 = int_to_ptr.vmem [resolvable:$true] %s94_s20  ;;  %s120_s23 = int_to_ptr.vmem [resolvable:$true] %s119_s23 }
  0x2e   :  { %s3646_s27 = scalar_lea.hbm %s4628_s5, 3456 }
  0x2f   :  { %p3647_p2 = scmp.ne.s32.totalorder %s4628_s5, %s3646_s27  ;;  %p3650_p3 = scmp.lt.u32.totalorder %s3646_s27, %s4628_s5 }
  0x31   :  { %p3652_p4 = pnand %p3650_p3, %p3647_p2 }
  0x33   :  { %3655 = shalt.err (!%p3652_p4)
}
  0x34   :  { %s3656_s3 = scalar_lea.vmem %s95_s20, 3456  ;;  %p3661_p6 = scmp.lt.s32.totalorder %s95_s20, %s95_s20 }
  0x35   :  { %p3657_p5 = scmp.ne.s32.totalorder %s95_s20, %s3656_s3  ;;  %p3662_p7 = scmp.lt.s32.totalorder %s3656_s3, %s3656_s3 }
  0x37   :  { %p3663_p8 = por %p3662_p7, %p3661_p6 }
  0x39   :  { %p3664_p9 = pnand %p3663_p8, %p3657_p5 }
  0x3b   :  { %3667 = shalt.err (!%p3664_p9)
}
  0x3c   :  { %100 = dma.hbm_to_vmem [thread:$0]  %s4628_s5, 3456, %s95_s20, [#allocation15], %s3998_s18, %s3998_s18, %s3999_s19  }
  0x3d   :  { %s3668_s21 = scalar_lea.hbm %s4630_s7, 16 }
  0x3e   :  { %p3669_p10 = scmp.ne.s32.totalorder %s4630_s7, %s3668_s21  ;;  %p3672_p11 = scmp.lt.u32.totalorder %s3668_s21, %s4630_s7 }
  0x40   :  { %p3674_p12 = pnand %p3672_p11, %p3669_p10 }
  0x42   :  { %3677 = shalt.err (!%p3674_p12)
}
  0x43   :  { %s3678_s29 = scalar_lea.vmem %s120_s23, 16  ;;  %s3682_s30 = scalar_lea.vmem %s120_s23, 32 }
  0x44   :  { %p3679_p13 = scmp.ne.s32.totalorder %s120_s23, %s3678_s29  ;;  %p3683_p0 = scmp.lt.s32.totalorder %s120_s23, %s120_s23 }
  0x45   :  { %p3684_p1 = scmp.lt.s32.totalorder %s3682_s30, %s3678_s29 }
  0x47   :  { %p3685_p2 = por %p3684_p1, %p3683_p0 }
  0x49   :  { %p3686_p3 = pnand %p3685_p2, %p3679_p13 }
  0x4b   :  { %3689 = shalt.err (!%p3686_p3)
}
  0x4c   :  { %122 = dma.hbm_to_vmem [thread:$0]  %s4630_s7, 16, %s120_s23, [#allocation18]  }
  0x4d   :  { %s4002_s0 = smov [#allocation20]   ;;  %s4003_s24 = smov [#allocation23]  }
  0x4e   :  { %s139_s3 = sshll.u32 %s4002_s0, 4  ;;  %s161_s1 = sshll.u32 %s4003_s24, 4  ;;  %s140_s3 = int_to_ptr.vmem [resolvable:$true] %s139_s3  ;;  %s162_s1 = int_to_ptr.vmem [resolvable:$true] %s161_s1 }
  0x4f   :  { %s3690_s21 = scalar_lea.hbm %s4632_s9, 16 }
  0x50   :  { %p3691_p4 = scmp.ne.s32.totalorder %s4632_s9, %s3690_s21  ;;  %p3694_p5 = scmp.lt.u32.totalorder %s3690_s21, %s4632_s9 }
  0x52   :  { %p3696_p6 = pnand %p3694_p5, %p3691_p4 }
  0x54   :  { %3699 = shalt.err (!%p3696_p6)
}
  0x55   :  { %s3700_s7 = scalar_lea.vmem %s140_s3, 16  ;;  %s3704_s23 = scalar_lea.vmem %s140_s3, 32 }
  0x56   :  { %p3701_p7 = scmp.ne.s32.totalorder %s140_s3, %s3700_s7  ;;  %p3705_p8 = scmp.lt.s32.totalorder %s140_s3, %s140_s3 }
  0x57   :  { %p3706_p9 = scmp.lt.s32.totalorder %s3704_s23, %s3700_s7 }
  0x59   :  { %p3707_p10 = por %p3706_p9, %p3705_p8 }
  0x5b   :  { %p3708_p11 = pnand %p3707_p10, %p3701_p7 }
  0x5d   :  { %3711 = shalt.err (!%p3708_p11)
}
  0x5e   :  { %142 = dma.hbm_to_vmem [thread:$0]  %s4632_s9, 16, %s140_s3, [#allocation21]  }
  0x5f   :  { %s3712_s0 = scalar_lea.hbm %s4634_s11, 16 }
  0x60   :  { %p3713_p12 = scmp.ne.s32.totalorder %s4634_s11, %s3712_s0  ;;  %p3716_p13 = scmp.lt.u32.totalorder %s3712_s0, %s4634_s11 }
  0x62   :  { %p3718_p0 = pnand %p3716_p13, %p3713_p12 }
  0x64   :  { %3721 = shalt.err (!%p3718_p0)
}
  0x65   :  { %s3722_s25 = scalar_lea.vmem %s162_s1, 16  ;;  %s3726_s26 = scalar_lea.vmem %s162_s1, 32 }
  0x66   :  { %p3723_p1 = scmp.ne.s32.totalorder %s162_s1, %s3722_s25  ;;  %p3727_p2 = scmp.lt.s32.totalorder %s162_s1, %s162_s1 }
  0x67   :  { %p3728_p3 = scmp.lt.s32.totalorder %s3726_s26, %s3722_s25 }
  0x69   :  { %p3729_p4 = por %p3728_p3, %p3727_p2 }
  0x6b   :  { %p3730_p5 = pnand %p3729_p4, %p3723_p1 }
  0x6d   :  { %3733 = shalt.err (!%p3730_p5)
}
  0x6e   :  { %164 = dma.hbm_to_vmem [thread:$0]  %s4634_s11, 16, %s162_s1, [#allocation24]  }
  0x6f   :  { %s4004_s27 = smov [#allocation26]   ;;  %s4005_s7 = smov [#allocation5]  }
  0x70   :  { %s181_s28 = sshll.u32 %s4004_s27, 4  ;;  %s36_s23 = sshll.u32 %s4005_s7, 4  ;;  %s182_s28 = int_to_ptr.vmem [resolvable:$true] %s181_s28  ;;  %s4192_s23 = int_to_ptr.vmem [resolvable:$true] %s36_s23 }
  0x71   :  { %s3734_s5 = scalar_lea.hbm %s4636_s13, 16 }
  0x72   :  { %p3735_p6 = scmp.ne.s32.totalorder %s4636_s13, %s3734_s5  ;;  %p3738_p7 = scmp.lt.u32.totalorder %s3734_s5, %s4636_s13 }
  0x74   :  { %p3740_p8 = pnand %p3738_p7, %p3735_p6 }
  0x76   :  { %3743 = shalt.err (!%p3740_p8)
}
  0x77   :  { %s3744_s11 = scalar_lea.vmem %s182_s28, 16  ;;  %s3748_s1 = scalar_lea.vmem %s182_s28, 32 }
  0x78   :  { %p3745_p9 = scmp.ne.s32.totalorder %s182_s28, %s3744_s11  ;;  %p3749_p10 = scmp.lt.s32.totalorder %s182_s28, %s182_s28 }
  0x79   :  { %p3750_p11 = scmp.lt.s32.totalorder %s3748_s1, %s3744_s11 }
  0x7b   :  { %p3751_p12 = por %p3750_p11, %p3749_p10 }
  0x7d   :  { %p3752_p13 = pnand %p3751_p12, %p3745_p9 }
  0x7f   :  { %3755 = shalt.err (!%p3752_p13)
}
  0x80   :  { %184 = dma.hbm_to_vmem [thread:$0]  %s4636_s13, 16, %s182_s28, [#allocation27]  }
  0x81   :  { %s4642_s9 = sld [smem:[#allocation42_spill]] }
  0x87   :  { %s3756_s3 = scalar_lea.hbm %s4642_s9, 512 }
  0x88   :  { %p3757_p0 = scmp.ne.s32.totalorder %s4642_s9, %s3756_s3  ;;  %p3760_p1 = scmp.lt.u32.totalorder %s3756_s3, %s4642_s9 }
  0x8a   :  { %p3762_p2 = pnand %p3760_p1, %p3757_p0 }
  0x8c   :  { %3765 = shalt.err (!%p3762_p2)
}
  0x8d   :  { %s3766_s5 = scalar_lea.vmem %s4192_s23, 512  ;;  %p3771_p4 = scmp.lt.s32.totalorder %s4192_s23, %s4192_s23 }
  0x8e   :  { %p3767_p3 = scmp.ne.s32.totalorder %s4192_s23, %s3766_s5  ;;  %p3772_p5 = scmp.lt.s32.totalorder %s3766_s5, %s3766_s5 }
  0x90   :  { %p3773_p6 = por %p3772_p5, %p3771_p4 }
  0x92   :  { %p3774_p7 = pnand %p3773_p6, %p3767_p3 }
  0x94   :  { %3777 = shalt.err (!%p3774_p7)
}
  0x95   :  { %42 = dma.hbm_to_vmem [thread:$0]  %s4642_s9, 512, %s4192_s23, [#allocation6], %s3998_s18, %s3998_s18, %s3999_s19  }
  0x96   :  { %s4006_s20 = smov [#allocation10]   ;;  %s4007_s24 = smov [#allocation13]  }
  0x97   :  { %s60_s0 = sshll.u32 %s4006_s20, 4  ;;  %s85_s22 = sshll.u32 %s4007_s24, 4  ;;  %s61_s0 = int_to_ptr.vmem [resolvable:$true] %s60_s0  ;;  %s86_s22 = int_to_ptr.vmem [resolvable:$true] %s85_s22 }
  0x98   :  { %s3778_s17 = scalar_lea.hbm %s4625_s2, 1024 }
  0x99   :  { %p3779_p8 = scmp.ne.s32.totalorder %s4625_s2, %s3778_s17  ;;  %p3782_p9 = scmp.lt.u32.totalorder %s3778_s17, %s4625_s2 }
  0x9b   :  { %p3784_p10 = pnand %p3782_p9, %p3779_p8 }
  0x9d   :  { %3787 = shalt.err (!%p3784_p10)
}
  0x9e   :  { %s3788_s23 = scalar_lea.vmem %s61_s0, 1024  ;;  %p3793_p12 = scmp.lt.s32.totalorder %s61_s0, %s61_s0 }
  0x9f   :  { %p3789_p11 = scmp.ne.s32.totalorder %s61_s0, %s3788_s23  ;;  %p3794_p13 = scmp.lt.s32.totalorder %s3788_s23, %s3788_s23 }
  0xa1   :  { %p3795_p0 = por %p3794_p13, %p3793_p12 }
  0xa3   :  { %p3796_p1 = pnand %p3795_p0, %p3789_p11 }
  0xa5   :  { %3799 = shalt.err (!%p3796_p1)
}
  0xa6   :  { %66 = dma.hbm_to_vmem [thread:$0]  %s4625_s2, 1024, %s61_s0, [#allocation9], %s3998_s18, %s3998_s18, %s3999_s19  }
  0xa7   :  { %s3800_s30 = scalar_lea.hbm %s4627_s4, 16 }
  0xa8   :  { %p3801_p2 = scmp.ne.s32.totalorder %s4627_s4, %s3800_s30  ;;  %p3804_p3 = scmp.lt.u32.totalorder %s3800_s30, %s4627_s4 }
  0xaa   :  { %p3806_p4 = pnand %p3804_p3, %p3801_p2 }
  0xac   :  { %3809 = shalt.err (!%p3806_p4)
}
  0xad   :  { %s3810_s24 = scalar_lea.vmem %s86_s22, 16  ;;  %s3814_s11 = scalar_lea.vmem %s86_s22, 32 }
  0xae   :  { %p3811_p5 = scmp.ne.s32.totalorder %s86_s22, %s3810_s24  ;;  %p3815_p6 = scmp.lt.s32.totalorder %s86_s22, %s86_s22 }
  0xaf   :  { %p3816_p7 = scmp.lt.s32.totalorder %s3814_s11, %s3810_s24 }
  0xb1   :  { %p3817_p8 = por %p3816_p7, %p3815_p6 }
  0xb3   :  { %p3818_p9 = pnand %p3817_p8, %p3811_p5 }
  0xb5   :  { %3821 = shalt.err (!%p3818_p9)
}
  0xb6   :  { %88 = dma.hbm_to_vmem [thread:$0]  %s4627_s4, 16, %s86_s22, [#allocation12]  }
  0xb7   :  { %s4008_s1 = smov [#allocation16]   ;;  %s4009_s21 = smov [#allocation19]  }
  0xb8   :  { %s106_s17 = sshll.u32 %s4008_s1, 4  ;;  %s129_s25 = sshll.u32 %s4009_s21, 4  ;;  %s107_s17 = int_to_ptr.vmem [resolvable:$true] %s106_s17  ;;  %s130_s25 = int_to_ptr.vmem [resolvable:$true] %s129_s25 }
  0xb9   :  { %s3822_s23 = scalar_lea.hbm %s4629_s6, 3456 }
  0xba   :  { %p3823_p10 = scmp.ne.s32.totalorder %s4629_s6, %s3822_s23  ;;  %p3826_p11 = scmp.lt.u32.totalorder %s3822_s23, %s4629_s6 }
  0xbc   :  { %p3828_p12 = pnand %p3826_p11, %p3823_p10 }
  0xbe   :  { %3831 = shalt.err (!%p3828_p12)
}
  0xbf   :  { %s3832_s4 = scalar_lea.vmem %s107_s17, 3456  ;;  %p3837_p0 = scmp.lt.s32.totalorder %s107_s17, %s107_s17 }
  0xc0   :  { %p3833_p13 = scmp.ne.s32.totalorder %s107_s17, %s3832_s4  ;;  %p3838_p1 = scmp.lt.s32.totalorder %s3832_s4, %s3832_s4 }
  0xc2   :  { %p3839_p2 = por %p3838_p1, %p3837_p0 }
  0xc4   :  { %p3840_p3 = pnand %p3839_p2, %p3833_p13 }
  0xc6   :  { %3843 = shalt.err (!%p3840_p3)
}
  0xc7   :  { %112 = dma.hbm_to_vmem [thread:$0]  %s4629_s6, 3456, %s107_s17, [#allocation15], %s3998_s18, %s3998_s18, %s3999_s19  }
  0xc8   :  { %s3844_s28 = scalar_lea.hbm %s4631_s8, 16 }
  0xc9   :  { %p3845_p4 = scmp.ne.s32.totalorder %s4631_s8, %s3844_s28  ;;  %p3848_p5 = scmp.lt.u32.totalorder %s3844_s28, %s4631_s8 }
  0xcb   :  { %p3850_p6 = pnand %p3848_p5, %p3845_p4 }
  0xcd   :  { %3853 = shalt.err (!%p3850_p6)
}
  0xce   :  { %s3854_s0 = scalar_lea.vmem %s130_s25, 16  ;;  %s3858_s1 = scalar_lea.vmem %s130_s25, 32 }
  0xcf   :  { %p3855_p7 = scmp.ne.s32.totalorder %s130_s25, %s3854_s0  ;;  %p3859_p8 = scmp.lt.s32.totalorder %s130_s25, %s130_s25 }
  0xd0   :  { %p3860_p9 = scmp.lt.s32.totalorder %s3858_s1, %s3854_s0 }
  0xd2   :  { %p3861_p10 = por %p3860_p9, %p3859_p8 }
  0xd4   :  { %p3862_p11 = pnand %p3861_p10, %p3855_p7 }
  0xd6   :  { %3865 = shalt.err (!%p3862_p11)
}
  0xd7   :  { %132 = dma.hbm_to_vmem [thread:$0]  %s4631_s8, 16, %s130_s25, [#allocation18]  }
  0xd8   :  { %s4010_s21 = smov [#allocation22]   ;;  %s4011_s3 = smov [#allocation25]  }
  0xd9   :  { %s148_s26 = sshll.u32 %s4010_s21, 4  ;;  %s171_s23 = sshll.u32 %s4011_s3, 4  ;;  %s149_s26 = int_to_ptr.vmem [resolvable:$true] %s148_s26  ;;  %s172_s23 = int_to_ptr.vmem [resolvable:$true] %s171_s23 }
  0xda   :  { %s3866_s7 = scalar_lea.hbm %s4633_s10, 3456 }
  0xdb   :  { %p3867_p12 = scmp.ne.s32.totalorder %s4633_s10, %s3866_s7  ;;  %p3870_p13 = scmp.lt.u32.totalorder %s3866_s7, %s4633_s10 }
  0xdd   :  { %p3872_p0 = pnand %p3870_p13, %p3867_p12 }
  0xdf   :  { %3875 = shalt.err (!%p3872_p0)
}
  0xe0   :  { %s3876_s8 = scalar_lea.vmem %s149_s26, 3456  ;;  %p3881_p2 = scmp.lt.s32.totalorder %s149_s26, %s149_s26 }
  0xe1   :  { %p3877_p1 = scmp.ne.s32.totalorder %s149_s26, %s3876_s8  ;;  %p3882_p3 = scmp.lt.s32.totalorder %s3876_s8, %s3876_s8 }
  0xe3   :  { %p3883_p4 = por %p3882_p3, %p3881_p2 }
  0xe5   :  { %p3884_p5 = pnand %p3883_p4, %p3877_p1 }
  0xe7   :  { %3887 = shalt.err (!%p3884_p5)
}
  0xe8   :  { %154 = dma.hbm_to_vmem [thread:$0]  %s4633_s10, 3456, %s149_s26, [#allocation21], %s3998_s18, %s3998_s18, %s3999_s19  }
  0xe9   :  { %s3888_s20 = scalar_lea.hbm %s4635_s12, 16 }
  0xea   :  { %p3889_p6 = scmp.ne.s32.totalorder %s4635_s12, %s3888_s20  ;;  %p3892_p7 = scmp.lt.u32.totalorder %s3888_s20, %s4635_s12 }
  0xec   :  { %p3894_p8 = pnand %p3892_p7, %p3889_p6 }
  0xee   :  { %3897 = shalt.err (!%p3894_p8)
}
  0xef   :  { %s3898_s1 = scalar_lea.vmem %s172_s23, 16  ;;  %s3902_s6 = scalar_lea.vmem %s172_s23, 32 }
  0xf0   :  { %p3899_p9 = scmp.ne.s32.totalorder %s172_s23, %s3898_s1  ;;  %p3903_p10 = scmp.lt.s32.totalorder %s172_s23, %s172_s23 }
  0xf1   :  { %p3904_p11 = scmp.lt.s32.totalorder %s3902_s6, %s3898_s1 }
  0xf3   :  { %p3905_p12 = por %p3904_p11, %p3903_p10 }
  0xf5   :  { %p3906_p13 = pnand %p3905_p12, %p3899_p9 }
  0xf7   :  { %3909 = shalt.err (!%p3906_p13)
}
  0xf8   :  { %174 = dma.hbm_to_vmem [thread:$0]  %s4635_s12, 16, %s172_s23, [#allocation24]  }
  0xf9   :  { %s4012_s21 = smov [#allocation28]   ;;  %s4013_s3 = smov [#allocation29]  }
  0xfa   :  { %s190_s26 = sshll.u32 %s4012_s21, 4  ;;  %s203_s9 = sshll.u32 %s4013_s3, 4  ;;  %s191_s26 = int_to_ptr.vmem [resolvable:$true] %s190_s26  ;;  %s204_s9 = int_to_ptr.vmem [resolvable:$true] %s203_s9 }
  0xfb   :  { %s3910_s29 = scalar_lea.hbm %s4637_s14, 1024 }
  0xfc   :  { %p3911_p0 = scmp.ne.s32.totalorder %s4637_s14, %s3910_s29  ;;  %p3914_p1 = scmp.lt.u32.totalorder %s3910_s29, %s4637_s14 }
  0xfe   :  { %p3916_p2 = pnand %p3914_p1, %p3911_p0 }
 0x100   :  { %3919 = shalt.err (!%p3916_p2)
}
 0x101   :  { %s3920_s12 = scalar_lea.vmem %s191_s26, 1024  ;;  %p3925_p4 = scmp.lt.s32.totalorder %s191_s26, %s191_s26 }
 0x102   :  { %p3921_p3 = scmp.ne.s32.totalorder %s191_s26, %s3920_s12  ;;  %p3926_p5 = scmp.lt.s32.totalorder %s3920_s12, %s3920_s12 }
 0x104   :  { %p3927_p6 = por %p3926_p5, %p3925_p4 }
 0x106   :  { %p3928_p7 = pnand %p3927_p6, %p3921_p3 }
 0x108   :  { %3931 = shalt.err (!%p3928_p7)
}
 0x109   :  { %196 = dma.hbm_to_vmem [thread:$0]  %s4637_s14, 1024, %s191_s26, [#allocation27], %s3998_s18, %s3998_s18, %s3999_s19  }
 0x10a   :  { %s3932_s28 = scalar_lea.hbm %s4638_s15, 64 }
 0x10b   :  { %p3933_p8 = scmp.ne.s32.totalorder %s4638_s15, %s3932_s28  ;;  %p3936_p9 = scmp.lt.u32.totalorder %s3932_s28, %s4638_s15 }
 0x10d   :  { %p3938_p10 = pnand %p3936_p9, %p3933_p8 }
 0x10f   :  { %3941 = shalt.err (!%p3938_p10)
}
 0x110   :  { %s3942_s0 = scalar_lea.vmem %s204_s9, 64  ;;  %p3947_p12 = scmp.lt.s32.totalorder %s204_s9, %s204_s9 }
 0x111   :  { %p3943_p11 = scmp.ne.s32.totalorder %s204_s9, %s3942_s0  ;;  %p3948_p13 = scmp.lt.s32.totalorder %s3942_s0, %s3942_s0 }
 0x113   :  { %p3949_p0 = por %p3948_p13, %p3947_p12 }
 0x115   :  { %p3950_p1 = pnand %p3949_p0, %p3943_p11 }
 0x117   :  { %3953 = shalt.err (!%p3950_p1)
}
 0x118   :  { %206 = dma.hbm_to_vmem [thread:$0]  %s4638_s15, 64, %s204_s9, [#allocation30]  }
 0x119   :  { %3976 = dma.done.wait [#allocation6], 512  }
 0x11a   :  { %3977 = vsyncadd [#allocation6], 4294966784 }
 0x11b   :  { %3978 = dma.done.wait [#allocation9], 1536  }
 0x11c   :  { %3979 = vsyncadd [#allocation9], 4294965760 }
 0x11d   :  { %3980 = dma.done.wait [#allocation12], 4112  }
 0x11e   :  { %3981 = vsyncadd [#allocation12], 4294963184 }
 0x11f   :  { %3982 = dma.done.wait [#allocation15], 6912  }
 0x120   :  { %3983 = vsyncadd [#allocation15], 4294960384 }
 0x121   :  { %3984 = dma.done.wait [#allocation18], 32  }
 0x122   :  { %3985 = vsyncadd [#allocation18], 4294967264 }
 0x123   :  { %3986 = dma.done.wait [#allocation21], 3472  }
 0x124   :  { %3987 = vsyncadd [#allocation21], 4294963824 }
 0x125   :  { %3988 = dma.done.wait [#allocation24], 32  }
 0x126   :  { %3989 = vsyncadd [#allocation24], 4294967264 }
 0x127   :  { %3990 = dma.done.wait [#allocation27], 1040  }
 0x128   :  { %3991 = vsyncadd [#allocation27], 4294966256 }
 0x129   :  { %3992 = dma.done.wait [#allocation30], 64  }
 0x12a   :  { %3993 = vsyncadd [#allocation30], 4294967232  ;;  %v370_v0 = vld [vmem:[#allocation11 + $0x80] sm:$0xff]  ;;  %v371_v1 = vld [vmem:[#allocation11 + $0x88] sm:$0xff]  ;;  %vm471_vm0 = vcmask 261120   ;;  %s4014_s15 = smov 4  }
 0x12b   :  { %v372_v2 = vld [vmem:[#allocation11 + $0x90] sm:$0xff]  ;;  %v3303_v3 = vpack.c.bf16 %v371_v1, %v370_v0  ;;  %v373_v4 = vld [vmem:[#allocation11 + $0x98] sm:$0xff]  ;;  %v263_v5 = vld [vmem:[#allocation11] sm:$0xff]  ;;  %vm682_vm1 = vcmask 31744   ;;  %vm687_vm2 = vcmask 589344   ;;  %vm712_vm3 = vcmask 556064  }
 0x12c   :  { %v264_v6 = vld [vmem:[#allocation11 + $0x8] sm:$0xff]  ;;  %v3307_v7 = vpack.c.bf16 %v373_v4, %v372_v2  ;;  %v374_v9 = vld [vmem:[#allocation11 + $0xa0] sm:$0xff]  ;;  %v265_v11 = vld [vmem:[#allocation11 + $0x10] sm:$0xff]  ;;  %vm677_vm4 = vcmask 581632   ;;  %vm776_vm5 = vcmask 588800   ;;  %vm4017_vm6 = vmmov 0  }
 0x12d   :  { %v3271_v8 = vpack.c.bf16 %v264_v6, %v263_v5  ;;  %v375_v10 = vld [vmem:[#allocation11 + $0xa8] sm:$0xff]  ;;  %3304 = vmatprep.subr.bf16.mxu1 %v3303_v3  ;;  %v266_v12 = vld [vmem:[#allocation11 + $0x18] sm:$0xff]  ;;  %v267_v14 = vld [vmem:[#allocation11 + $0x20] sm:$0xff]  ;;  %vm1437_vm7 = vcmask 523264   ;;  %vm1638_vm8 = vcmask 1043456   ;;  %s4018_s6 = smov [#allocation31]  }
 0x12e   :  { %3306 = vmatpush3.bf16.msra.mxu1 %v3303_v3  ;;  %v3275_v13 = vpack.c.bf16 %v266_v12, %v265_v11  ;;  %v268_v15 = vld [vmem:[#allocation11 + $0x28] sm:$0xff]  ;;  %v3311_v16 = vpack.c.bf16 %v375_v10, %v374_v9  ;;  %v376_v17 = vld [vmem:[#allocation11 + $0xb0] sm:$0xff]  ;;  %v377_v18 = vld [vmem:[#allocation11 + $0xb8] sm:$0xff]  ;;  %s2559_s10 = sshll.u32 %s4018_s6, 4  ;;  %s2560_s10 = int_to_ptr.vmem [resolvable:$true] %s2559_s10 }
 0x12f   :  { %3272 = vmatprep.subr.bf16.mxu0 %v3271_v8  ;;  %3308 = vmatprep.subr.bf16.mxu1 %v3307_v7  ;;  %v3279_v19 = vpack.c.bf16 %v268_v15, %v267_v14  ;;  %v269_v20 = vld [vmem:[#allocation11 + $0x30] sm:$0xff]  ;;  %v270_v21 = vld [vmem:[#allocation11 + $0x38] sm:$0xff]  ;;  %v3315_v22 = vpack.c.bf16 %v377_v18, %v376_v17  ;;  %v378_v23 = vld [vmem:[#allocation11 + $0xc0] sm:$0xff]  ;;  %s3954_s17 = scalar_lea.vmem %s2560_s10, 512  ;;  %p3959_p3 = scmp.lt.s32.totalorder %s2560_s10, %s2560_s10 }
 0x130   :  { %3274 = vmatpush3.bf16.msra.mxu0 %v3271_v8  ;;  %v379_v24 = vld [vmem:[#allocation11 + $0xc8] sm:$0xff]  ;;  %v3283_v25 = vpack.c.bf16 %v270_v21, %v269_v20  ;;  %v255_v26 = vld [vmem:[#allocation5] sm:$0xff]  ;;  %v380_v30 = vld [vmem:[#allocation11 + $0xd0] sm:$0xff]  ;;  %p3955_p2 = scmp.ne.s32.totalorder %s2560_s10, %s3954_s17  ;;  %p3960_p4 = scmp.lt.s32.totalorder %s3954_s17, %s3954_s17 }
 0x131   :  { %3276 = vmatprep.subr.bf16.mxu0 %v3275_v13  ;;  %v271_v27 = vld [vmem:[#allocation11 + $0x40] sm:$0xff]  ;;  %v272_v28 = vld [vmem:[#allocation11 + $0x48] sm:$0xff]  ;;  %2925 = vmatprep.mubr.f32.mxu1 %v255_v26  ;;  %v3319_v29 = vpack.c.bf16 %v379_v24, %v378_v23  ;;  %v381_v31 = vld [vmem:[#allocation11 + $0xd8] sm:$0xff] }
 0x132   :  { %3310 = vmatpush3.bf16.msra.mxu1 %v3307_v7  ;;  %2887 = vmatprep.mubr.f32.mxu0 %v255_v26  ;;  %v3287_v32 = vpack.c.bf16 %v272_v28, %v271_v27  ;;  %v273_v33 = vld [vmem:[#allocation11 + $0x50] sm:$0xff]  ;;  %v274_v34 = vld [vmem:[#allocation11 + $0x58] sm:$0xff]  ;;  %v3323_v35 = vpack.c.bf16 %v381_v31, %v380_v30  ;;  %v382_v36 = vld [vmem:[#allocation11 + $0xe0] sm:$0xff]  ;;  %p3961_p5 = por %p3960_p4, %p3959_p3 }
 0x133   :  { %3312 = vmatprep.subr.bf16.mxu1 %v3311_v16  ;;  %v383_v37 = vld [vmem:[#allocation11 + $0xe8] sm:$0xff]  ;;  %v3291_v38 = vpack.c.bf16 %v274_v34, %v273_v33  ;;  %v275_v39 = vld [vmem:[#allocation11 + $0x60] sm:$0xff]  ;;  %v384_v42 = vld [vmem:[#allocation11 + $0xf0] sm:$0xff] }
 0x134   :  { %3278 = vmatpush3.bf16.msra.mxu0 %v3275_v13  ;;  %v276_v40 = vld [vmem:[#allocation11 + $0x68] sm:$0xff]  ;;  %v3327_v41 = vpack.c.bf16 %v383_v37, %v382_v36  ;;  %v385_v43 = vld [vmem:[#allocation11 + $0xf8] sm:$0xff]  ;;  %v277_v45 = vld [vmem:[#allocation11 + $0x70] sm:$0xff]  ;;  %p3962_p6 = pnand %p3961_p5, %p3955_p2 }
 0x135   :  { %3280 = vmatprep.subr.bf16.mxu0 %v3279_v19  ;;  %v3295_v44 = vpack.c.bf16 %v276_v40, %v275_v39  ;;  %v278_v46 = vld [vmem:[#allocation11 + $0x78] sm:$0xff]  ;;  %v3331_v47 = vpack.c.bf16 %v385_v43, %v384_v42  ;;  %v256_v49 = vld [vmem:[#allocation5 + $0x8] sm:$0xff]  ;;  %v257_v50 = vld [vmem:[#allocation5 + $0x10] sm:$0xff] }
 0x136   :  { %3314 = vmatpush3.bf16.msra.mxu1 %v3311_v16  ;;  %v3299_v48 = vpack.c.bf16 %v278_v46, %v277_v45  ;;  %v258_v51 = vld [vmem:[#allocation5 + $0x18] sm:$0xff]  ;;  %v365_v52 = vld [vmem:[#allocation10 + $0x20] sm:$0xff]  ;;  %v694_v54 = vld [vmem:[#allocation8 + $0x10] sm:$0xff] }
 0x137   :  { %3316 = vmatprep.subr.bf16.mxu1 %v3315_v22  ;;  %v692_v53 = vld [vmem:[#allocation8] sm:$0xff]  ;;  %704 = vrot.lane.b32.xlu1 %v694_v54, %s4014_s15  ;;  %v693_v55 = vld [vmem:[#allocation8 + $0x8] sm:$0xff]  ;;  %v695_v56 = vld [vmem:[#allocation8 + $0x18] sm:$0xff] }
 0x138   :  { %3282 = vmatpush3.bf16.msra.mxu0 %v3279_v19  ;;  %700 = vrot.lane.b32.xlu0 %v692_v53, %s4014_s15  ;;  %v366_v5 = vld [vmem:[#allocation10 + $0x28] sm:$0xff]  ;;  %v367_v6 = vld [vmem:[#allocation10 + $0x30] sm:$0xff]  ;;  %v368_v7 = vld [vmem:[#allocation10 + $0x38] sm:$0xff]  ;;  %v4015_v19 = vmov 0.0  }
 0x139   :  { %3284 = vmatprep.subr.bf16.mxu0 %v3283_v25  ;;  %v259_v8 = vld [vmem:[#allocation10] sm:$0xff]  ;;  %v260_v9 = vld [vmem:[#allocation10 + $0x8] sm:$0xff]  ;;  %v261_v10 = vld [vmem:[#allocation10 + $0x10] sm:$0xff]  ;;  %683 = vst.msk [vmem:[#allocation2 + $0x1] sm:$0xff] %vm682_vm1, %v4015_v19 }
 0x13a   :  { %3318 = vmatpush3.bf16.msra.mxu1 %v3315_v22  ;;  %v262_v11 = vld [vmem:[#allocation10 + $0x18] sm:$0xff]  ;;  %v767_v12 = vld [vmem:[#allocation14 + $0x48] sm:$0xff]  ;;  %v770_v18 = vld [vmem:[#allocation14 + $0x60] sm:$0xff]  ;;  %684 = vst.msk [vmem:[#allocation2 + $0x9] sm:$0xff] %vm682_vm1, %v4015_v19 }
 0x13b   :  { %3320 = vmatprep.subr.bf16.mxu1 %v3319_v29  ;;  %706 = vrot.lane.b32.xlu1 %v695_v56, %s4014_s15  ;;  %v768_v13 = vld [vmem:[#allocation14 + $0x50] sm:$0xff]  ;;  %v769_v14 = vld [vmem:[#allocation14 + $0x58] sm:$0xff]  ;;  %685 = vst.msk [vmem:[#allocation2 + $0x19] sm:$0xff] %vm682_vm1, %v4015_v19  ;;  %686 = vst.msk [vmem:[#allocation2 + $0x21] sm:$0xff] %vm682_vm1, %v4015_v19 }
 0x13c   :  { %3286 = vmatpush3.bf16.msra.mxu0 %v3283_v25  ;;  %702 = vrot.lane.b32.xlu0 %v693_v55, %s4014_s15  ;;  %v3351_v17 = vpack.c.bf16 %v768_v13, %v767_v12  ;;  %721 = vst.msk [vmem:[#allocation3 + $0x1] sm:$0xff] %vm682_vm1, %v4015_v19  ;;  %722 = vst.msk [vmem:[#allocation3 + $0x9] sm:$0xff] %vm682_vm1, %v4015_v19  ;;  %v3355_v20 = vpack.c.bf16 %v770_v18, %v769_v14  ;;  %v771_v21 = vld [vmem:[#allocation14 + $0x68] sm:$0xff]  ;;  %v772_v22 = vld [vmem:[#allocation14 + $0x70] sm:$0xff] }
 0x13d   :  { %3288 = vmatprep.subr.bf16.mxu0 %v3287_v32  ;;  %723 = vst.msk [vmem:[#allocation3 + $0x19] sm:$0xff] %vm682_vm1, %v4015_v19  ;;  %724 = vst.msk [vmem:[#allocation3 + $0x21] sm:$0xff] %vm682_vm1, %v4015_v19  ;;  %v3359_v25 = vpack.c.bf16 %v772_v22, %v771_v21  ;;  %v773_v26 = vld [vmem:[#allocation14 + $0x78] sm:$0xff]  ;;  %v774_v27 = vld [vmem:[#allocation14 + $0x80] sm:$0xff] }
 0x13e   :  { %3322 = vmatpush3.bf16.msra.mxu1 %v3319_v29  ;;  %1809 = vst.msk [vmem:[#allocation4 + $0x1] sm:$0xff] %vm682_vm1, %v4015_v19  ;;  %1810 = vst.msk [vmem:[#allocation4 + $0x9] sm:$0xff] %vm682_vm1, %v4015_v19  ;;  %v3363_v28 = vpack.c.bf16 %v774_v27, %v773_v26  ;;  %v775_v30 = vld [vmem:[#allocation14 + $0x88] sm:$0xff]  ;;  %v753_v31 = vld [vmem:[#allocation14] sm:$0xff] }
 0x13f   :  { %3324 = vmatprep.subr.bf16.mxu1 %v3323_v35  ;;  %1811 = vst.msk [vmem:[#allocation4 + $0x19] sm:$0xff] %vm682_vm1, %v4015_v19  ;;  %1812 = vst.msk [vmem:[#allocation4 + $0x21] sm:$0xff] %vm682_vm1, %v4015_v19  ;;  %v755_v33 = vld [vmem:[#allocation14 + $0x10] sm:$0xff]  ;;  %v756_v34 = vld [vmem:[#allocation14 + $0x18] sm:$0xff] }
 0x140   :  { %3290 = vmatpush3.bf16.msra.mxu0 %v3287_v32  ;;  %688 = vst.msk [vmem:[#allocation2 + $0x1] sm:$0xff] %vm687_vm2, %v4015_v19  ;;  %689 = vst.msk [vmem:[#allocation2 + $0x9] sm:$0xff] %vm687_vm2, %v4015_v19  ;;  %v754_v32 = vld [vmem:[#allocation14 + $0x8] sm:$0xff]  ;;  %v3371_v37 = vpack.c.bf16 %v756_v34, %v755_v33  ;;  %v757_v39 = vld [vmem:[#allocation14 + $0x20] sm:$0xff] }
 0x141   :  { %3292 = vmatprep.subr.bf16.mxu0 %v3291_v38  ;;  %690 = vst.msk [vmem:[#allocation2 + $0x19] sm:$0xff] %vm687_vm2, %v4015_v19  ;;  %691 = vst.msk [vmem:[#allocation2 + $0x21] sm:$0xff] %vm687_vm2, %v4015_v19  ;;  %v758_v40 = vld [vmem:[#allocation14 + $0x28] sm:$0xff]  ;;  %v760_v45 = vld [vmem:[#allocation14 + $0x38] sm:$0xff] }
 0x142   :  { %3326 = vmatpush3.bf16.msra.mxu1 %v3323_v35  ;;  %725 = vst.msk [vmem:[#allocation3 + $0x1] sm:$0xff] %vm687_vm2, %v4015_v19  ;;  %726 = vst.msk [vmem:[#allocation3 + $0x9] sm:$0xff] %vm687_vm2, %v4015_v19  ;;  %v3367_v35 = vpack.c.bf16 %v754_v32, %v753_v31  ;;  %v3375_v42 = vpack.c.bf16 %v758_v40, %v757_v39  ;;  %v980_v56 = vld [vmem:[#allocation14 + $0xb0] sm:$0xff]  ;;  %v1111_v14 = vld [vmem:[#allocation16 + $0x80] sm:$0xff] }
 0x143   :  { %3328 = vmatprep.subr.bf16.mxu1 %v3327_v41  ;;  %727 = vst.msk [vmem:[#allocation3 + $0x19] sm:$0xff] %vm687_vm2, %v4015_v19  ;;  %728 = vst.msk [vmem:[#allocation3 + $0x21] sm:$0xff] %vm687_vm2, %v4015_v19  ;;  %v1110_v13 = vld [vmem:[#allocation16 + $0x78] sm:$0xff]  ;;  %v1091_v18 = vld [vmem:[#allocation16 + $0x8] sm:$0xff] }
 0x144   :  { %3294 = vmatpush3.bf16.msra.mxu0 %v3291_v38  ;;  %1813 = vst.msk [vmem:[#allocation4 + $0x1] sm:$0xff] %vm687_vm2, %v4015_v19  ;;  %1814 = vst.msk [vmem:[#allocation4 + $0x9] sm:$0xff] %vm687_vm2, %v4015_v19  ;;  %v2587_v21 = vld [vmem:[#allocation13] ss:$0 sm:$0xff]  ;;  %v1092_v34 = vld [vmem:[#allocation16 + $0x10] sm:$0xff] }
 0x145   :  { %3296 = vmatprep.subr.bf16.mxu0 %v3295_v44  ;;  %1815 = vst.msk [vmem:[#allocation4 + $0x19] sm:$0xff] %vm687_vm2, %v4015_v19  ;;  %1816 = vst.msk [vmem:[#allocation4 + $0x21] sm:$0xff] %vm687_vm2, %v4015_v19  ;;  %v1094_v39 = vld [vmem:[#allocation16 + $0x20] sm:$0xff]  ;;  %v1095_v40 = vld [vmem:[#allocation16 + $0x28] sm:$0xff] }
 0x146   :  { %3330 = vmatpush3.bf16.msra.mxu1 %v3327_v41  ;;  %678 = vst.msk [vmem:[#allocation2] sm:$0x1] %vm677_vm4, %v4015_v19  ;;  %679 = vst.msk [vmem:[#allocation2 + $0x18] sm:$0x1] %vm677_vm4, %v4015_v19 }
 0x147   :  { %3332 = vmatprep.subr.bf16.mxu1 %v3331_v47  ;;  %680 = vst.msk [vmem:[#allocation2 + $0x11] sm:$0x1] %vm677_vm4, %v4015_v19  ;;  %681 = vst.msk [vmem:[#allocation2 + $0x29] sm:$0x1] %vm677_vm4, %v4015_v19 }
 0x148   :  { %3298 = vmatpush3.bf16.msra.mxu0 %v3295_v44  ;;  %717 = vst.msk [vmem:[#allocation3] sm:$0x1] %vm677_vm4, %v4015_v19  ;;  %718 = vst.msk [vmem:[#allocation3 + $0x18] sm:$0x1] %vm677_vm4, %v4015_v19  ;;  %v759_v44 = vld [vmem:[#allocation14 + $0x30] sm:$0xff] }
 0x149   :  { %3300 = vmatprep.subr.bf16.mxu0 %v3299_v48  ;;  %719 = vst.msk [vmem:[#allocation3 + $0x11] sm:$0x1] %vm677_vm4, %v4015_v19  ;;  %720 = vst.msk [vmem:[#allocation3 + $0x29] sm:$0x1] %vm677_vm4, %v4015_v19  ;;  %v3379_v46 = vpack.c.bf16 %v760_v45, %v759_v44  ;;  %v1096_v44 = vld [vmem:[#allocation16 + $0x30] sm:$0xff]  ;;  %v1097_v45 = vld [vmem:[#allocation16 + $0x38] sm:$0xff] }
 0x14a   :  { %3334 = vmatpush3.bf16.msra.mxu1 %v3331_v47  ;;  %1805 = vst.msk [vmem:[#allocation4] sm:$0x1] %vm677_vm4, %v4015_v19  ;;  %1806 = vst.msk [vmem:[#allocation4 + $0x18] sm:$0x1] %vm677_vm4, %v4015_v19  ;;  %v761_v47 = vld [vmem:[#allocation14 + $0x40] sm:$0xff] }
 0x14b   :  { %1807 = vst.msk [vmem:[#allocation4 + $0x11] sm:$0x1] %vm677_vm4, %v4015_v19  ;;  %1808 = vst.msk [vmem:[#allocation4 + $0x29] sm:$0x1] %vm677_vm4, %v4015_v19  ;;  %3352 = vmatprep.subr.bf16.mxu1 %v3351_v17 }
 0x14c   :  { %3302 = vmatpush3.bf16.msra.mxu0 %v3299_v48  ;;  %v976_v48 = vld [vmem:[#allocation14 + $0x90] sm:$0xff] }
 0x14d   :  { %2926 = vmatmul.mubr.f32.vlgmr.msra.gmra.mrb[0].mxu1 %v256_v49 }
 0x14e   :  { %2928 = vmatprep.mubr.f32.mxu1 %v257_v50  ;;  %3354 = vmatpush3.bf16.msra.mxu1 %v3351_v17  ;;  %v1090_v17 = vld [vmem:[#allocation16] sm:$0xff] }
 0x14f   :  { %2888 = vmatmul.mubr.f32.vlgmr.msra.gmra.mrb[0].mxu0 %v256_v49  ;;  %3356 = vmatprep.subr.bf16.mxu1 %v3355_v20  ;;  %v977_v49 = vld [vmem:[#allocation14 + $0x98] sm:$0xff] }
 0x150   :  { %2890 = vmatprep.mubr.f32.mxu0 %v257_v50  ;;  %v978_v50 = vld [vmem:[#allocation14 + $0xa0] sm:$0xff] }
 0x151   :  { %2929 = vmatmul.mubr.f32.gmra.mrb[2].mxu1 %v258_v51 }
 0x152   :  { %3358 = vmatpush3.bf16.msra.mxu1 %v3355_v20  ;;  %v3415_v20 = vpack.c.bf16 %v1091_v18, %v1090_v17  ;;  %v2612_v18 = vld [vmem:[#allocation17] ss:$0 sm:$0xff] }
 0x153   :  { %2891 = vmatmul.mubr.f32.gmra.mrb[2].mxu0 %v258_v51  ;;  %3360 = vmatprep.subr.bf16.mxu1 %v3359_v25  ;;  %v979_v51 = vld [vmem:[#allocation14 + $0xa8] sm:$0xff] }
 0x154   :  { %2939 = vmatprep.mubr.msk.f32.mxu0 %vm471_vm0, %v365_v52  ;;  %v3383_v52 = vpack.c.bf16 %v977_v49, %v976_v48  ;;  %v3387_v54 = vpack.c.bf16 %v979_v51, %v978_v50  ;;  %v1098_v48 = vld [vmem:[#allocation16 + $0x40] sm:$0xff]  ;;  %v1312_v49 = vld [vmem:[#allocation16 + $0x90] sm:$0xff]  ;;  %v1313_v50 = vld [vmem:[#allocation16 + $0x98] sm:$0xff] }
 0x155   :  { %v1314_v51 = vld [vmem:[#allocation16 + $0xa0] sm:$0xff] }
 0x156   :  { %3362 = vmatpush3.bf16.msra.mxu1 %v3359_v25 }
 0x157   :  { %3364 = vmatprep.subr.bf16.mxu1 %v3363_v28 }
 0x15a   :  { %3366 = vmatpush3.bf16.msra.mxu1 %v3363_v28 }
 0x15b   :  { %2975 = vmatprep.subr.mxu1 %v775_v30 }
 0x15e   :  { %2976 = vmatpush3.msra.mxu1 %v775_v30 }
 0x15f   :  { %3368 = vmatprep.subr.bf16.mxu1 %v3367_v35 }
 0x1a9   :  { %v705_v16 = vpop.permute.xlu1 %704 }
 0x1aa   :  { %v701_v15 = vpop.permute.xlu0 %700  ;;  %715 = vst.msk [vmem:[#allocation2 + $0x19] sm:$0xff] %vm712_vm3, %v705_v16  ;;  %v1112_v16 = vld [vmem:[#allocation16 + $0x88] sm:$0xff] }
 0x1ab   :  { %713 = vst.msk [vmem:[#allocation2 + $0x1] sm:$0xff] %vm712_vm3, %v701_v15  ;;  %v3411_v15 = vpack.c.bf16 %v1111_v14, %v1110_v13  ;;  %v1473_v13 = vld [vmem:[#allocation28 + $0x28] sm:$0xff] }
 0x1ad   :  { %v707_v24 = vpop.permute.xlu1 %706 }
 0x1ae   :  { %v703_v23 = vpop.permute.xlu0 %702  ;;  %716 = vst.msk [vmem:[#allocation2 + $0x21] sm:$0xff] %vm712_vm3, %v707_v24 }
 0x1af   :  { %714 = vst.msk [vmem:[#allocation2 + $0x9] sm:$0xff] %vm712_vm3, %v703_v23 }
 0x1b1   :  { %v764_v38 = vld [vmem:[#allocation2 + $0x19] sm:$0xff] }
 0x1b2   :  { %v762_v29 = vld [vmem:[#allocation2 + $0x1] sm:$0xff]  ;;  %v751_v55 = vld [vmem:[#allocation2 + $0x18] sm:$0xff] }
 0x1b3   :  { %2977 = vmatprep.mubr.msk.f32.mxu1 %vm776_vm5, %v762_v29  ;;  %v749_v43 = vld [vmem:[#allocation2] sm:$0xff] }
 0x1b5   :  { %v765_v41 = vld [vmem:[#allocation2 + $0x21] sm:$0xff] }
 0x1b6   :  { %v763_v36 = vld [vmem:[#allocation2 + $0x9] sm:$0xff] }
 0x1b7   :  { %2978 = vmatmul.mubr.msk.f32.vlgmr.msra.gmra.mrb[4].mxu1 %vm776_vm5, %v763_v36  ;;  %v750_v53 = vld [vmem:[#allocation2 + $0x8] sm:$0xff] }
 0x1b8   :  { %3370 = vmatpush3.bf16.msra.mxu1 %v3367_v35  ;;  %2980 = vmatprep.mubr.msk.f32.mxu1 %vm776_vm5, %v764_v38  ;;  %v1093_v35 = vld [vmem:[#allocation16 + $0x18] sm:$0xff] }
 0x1b9   :  { %3372 = vmatprep.subr.bf16.mxu1 %v3371_v37 }
 0x1bb   :  { %2981 = vmatmul.mubr.msk.f32.gmra.mrb[6].mxu1 %vm776_vm5, %v765_v41 }
 0x1bc   :  { %3374 = vmatpush3.bf16.msra.mxu1 %v3371_v37  ;;  %3001 = vmatprep.mubr.msk.f32.mxu1 %vm776_vm5, %v749_v43  ;;  %v3419_v37 = vpack.c.bf16 %v1093_v35, %v1092_v34 }
 0x1bd   :  { %3376 = vmatprep.subr.bf16.mxu1 %v3375_v42 }
 0x1c0   :  { %3378 = vmatpush3.bf16.msra.mxu1 %v3375_v42  ;;  %v3423_v42 = vpack.c.bf16 %v1095_v40, %v1094_v39 }
 0x1c1   :  { %3380 = vmatprep.subr.bf16.mxu1 %v3379_v46 }
 0x1c4   :  { %3382 = vmatpush3.bf16.msra.mxu1 %v3379_v46 }
 0x1c5   :  { %2999 = vmatprep.subr.mxu1 %v761_v47 }
 0x1c8   :  { %3000 = vmatpush3.msra.mxu1 %v761_v47  ;;  %v3427_v47 = vpack.c.bf16 %v1097_v45, %v1096_v44 }
 0x1c9   :  { %3384 = vmatprep.subr.bf16.mxu1 %v3383_v52  ;;  %3002 = vmatmul.mubr.msk.f32.vlgmr.msra.gmra.mrb[4].mxu1 %vm776_vm5, %v750_v53  ;;  %v3431_v53 = vpack.c.bf16 %v1313_v50, %v1312_v49 }
 0x1ca   :  { %3386 = vmatpush3.bf16.msra.mxu1 %v3383_v52  ;;  %3004 = vmatprep.mubr.msk.f32.mxu1 %vm776_vm5, %v751_v55  ;;  %v1315_v52 = vld [vmem:[#allocation16 + $0xa8] sm:$0xff] }
 0x1cb   :  { %3388 = vmatprep.subr.bf16.mxu1 %v3387_v54 }
 0x1ce   :  { %3390 = vmatpush3.bf16.msra.mxu1 %v3387_v54  ;;  %v3435_v54 = vpack.c.bf16 %v1315_v52, %v1314_v51 }
 0x220   :  { %v2927_v57 = vpop.f32.mrb[0].mxu1 }
 0x221   :  { %v452_v58 = vpop.f32.mrb[1].mxu1 }
 0x222   :  { %v2889_v59 = vpop.f32.mrb[0].mxu0  ;;  %v3335_v60 = vpack.c.bf16 %v2927_v57, %v452_v58  ;;  %v981_v57 = vld [vmem:[#allocation14 + $0xb8] sm:$0xff]  ;;  %v752_v58 = vld [vmem:[#allocation2 + $0x20] sm:$0xff] }
 0x223   :  { %v345_v61 = vpop.f32.mrb[1].mxu0  ;;  %3005 = vmatmul.mubr.msk.f32.gmra.mrb[6].mxu1 %vm776_vm5, %v752_v58 }
 0x224   :  { %v3343_v62 = vpack.c.bf16 %v2889_v59, %v345_v61  ;;  %v2930_v63 = vpop.f32.mrb[2].mxu1  ;;  %3336 = vmatprep.subr.bf16.mxu0 %v3335_v60  ;;  %v3391_v59 = vpack.c.bf16 %v981_v57, %v980_v56  ;;  %v982_v61 = vld [vmem:[#allocation14 + $0xc0] sm:$0xff]  ;;  %v1316_v56 = vld [vmem:[#allocation16 + $0xb0] sm:$0xff]  ;;  %v1317_v57 = vld [vmem:[#allocation16 + $0xb8] sm:$0xff] }
 0x225   :  { %v462_v0 = vpop.f32.mrb[3].mxu1  ;;  %3338 = vmatpush3.bf16.msra.mxu0 %v3335_v60  ;;  %v971_v60 = vld [vmem:[#allocation2 + $0x2] sm:$0xff] }
 0x226   :  { %v2892_v1 = vpop.f32.mrb[2].mxu0  ;;  %v3339_v2 = vpack.c.bf16 %v2930_v63, %v462_v0  ;;  %3025 = vmatprep.mubr.msk.f32.mxu1 %vm776_vm5, %v971_v60  ;;  %3392 = vmatprep.subr.bf16.mxu1 %v3391_v59  ;;  %v984_v0 = vld [vmem:[#allocation14 + $0xd0] sm:$0xff] }
 0x227   :  { %v355_v3 = vpop.f32.mrb[3].mxu0  ;;  %3394 = vmatpush3.bf16.msra.mxu1 %v3391_v59  ;;  %v3439_v59 = vpack.c.bf16 %v1317_v57, %v1316_v56 }
 0x228   :  { %v3347_v4 = vpack.c.bf16 %v2892_v1, %v355_v3  ;;  %3340 = vmatprep.subr.bf16.mxu0 %v3339_v2  ;;  %v1104_v1 = vld [vmem:[#allocation16 + $0x48] sm:$0xff]  ;;  %v1106_v3 = vld [vmem:[#allocation16 + $0x58] sm:$0xff] }
 0x229   :  { %3342 = vmatpush3.bf16.msra.mxu0 %v3339_v2  ;;  %v1105_v2 = vld [vmem:[#allocation16 + $0x50] sm:$0xff] }
 0x22a   :  { %3344 = vmatprep.subr.bf16.mxu0 %v3343_v62 }
 0x22c   :  { %2940 = vmatmul.mubr.msk.f32.vlgmr.msra.gmra.mrb[4].mxu0 %vm471_vm0, %v366_v5  ;;  %v3399_v5 = vpack.c.bf16 %v1105_v2, %v1104_v1  ;;  %v1320_v1 = vld [vmem:[#allocation16 + $0xd0] sm:$0xff] }
 0x22d   :  { %3346 = vmatpush3.bf16.msra.mxu0 %v3343_v62  ;;  %2942 = vmatprep.mubr.msk.f32.mxu0 %vm471_vm0, %v367_v6  ;;  %v983_v62 = vld [vmem:[#allocation14 + $0xc8] sm:$0xff]  ;;  %v972_v6 = vld [vmem:[#allocation2 + $0xa] sm:$0xff] }
 0x22e   :  { %3348 = vmatprep.subr.bf16.mxu0 %v3347_v4  ;;  %v3395_v63 = vpack.c.bf16 %v983_v62, %v982_v61  ;;  %v1318_v61 = vld [vmem:[#allocation16 + $0xc0] sm:$0xff]  ;;  %v1319_v62 = vld [vmem:[#allocation16 + $0xc8] sm:$0xff] }
 0x230   :  { %2943 = vmatmul.mubr.msk.f32.gmra.mrb[6].mxu0 %vm471_vm0, %v368_v7  ;;  %3396 = vmatprep.subr.bf16.mxu1 %v3395_v63  ;;  %v973_v7 = vld [vmem:[#allocation2 + $0x1a] sm:$0xff] }
 0x231   :  { %3350 = vmatpush3.bf16.msra.mxu0 %v3347_v4  ;;  %2953 = vmatprep.mubr.msk.f32.mxu0 %vm471_vm0, %v259_v8  ;;  %v1107_v4 = vld [vmem:[#allocation16 + $0x60] sm:$0xff] }
 0x232   :  { %3398 = vmatpush3.bf16.msra.mxu1 %v3395_v63  ;;  %v3403_v8 = vpack.c.bf16 %v1107_v4, %v1106_v3 }
 0x233   :  { %3023 = vmatprep.subr.mxu1 %v984_v0 }
 0x234   :  { %2954 = vmatmul.mubr.msk.f32.vlgmr.msra.gmra.mrb[4].mxu0 %vm471_vm0, %v260_v9  ;;  %v1108_v9 = vld [vmem:[#allocation16 + $0x68] sm:$0xff] }
 0x235   :  { %2956 = vmatprep.mubr.msk.f32.mxu0 %vm471_vm0, %v261_v10  ;;  %v1109_v10 = vld [vmem:[#allocation16 + $0x70] sm:$0xff] }
 0x236   :  { %3024 = vmatpush3.msra.mxu1 %v984_v0  ;;  %v3407_v12 = vpack.c.bf16 %v1109_v10, %v1108_v9  ;;  %v3443_v0 = vpack.c.bf16 %v1319_v62, %v1318_v61  ;;  %v1470_v9 = vld [vmem:[#allocation28 + $0x10] sm:$0xff]  ;;  %v1471_v10 = vld [vmem:[#allocation28 + $0x18] sm:$0xff] }
 0x237   :  { %3026 = vmatmul.mubr.msk.f32.vlgmr.msra.gmra.mrb[4].mxu1 %vm776_vm5, %v972_v6  ;;  %3400 = vmatprep.subr.bf16.mxu1 %v3399_v5  ;;  %v1469_v6 = vld [vmem:[#allocation28 + $0x8] sm:$0xff] }
 0x238   :  { %2957 = vmatmul.mubr.msk.f32.gmra.mrb[6].mxu0 %vm471_vm0, %v262_v11  ;;  %3028 = vmatprep.mubr.msk.f32.mxu1 %vm776_vm5, %v973_v7  ;;  %v974_v11 = vld [vmem:[#allocation2 + $0x22] sm:$0xff] }
 0x239   :  { %3402 = vmatpush3.bf16.msra.mxu1 %v3399_v5  ;;  %v1468_v5 = vld [vmem:[#allocation28] sm:$0xff]  ;;  %3119 = vmatprep.mubr.msk.f32.mxu0 %vm4017_vm6, %v4015_v19 }
 0x23a   :  { %3404 = vmatprep.subr.bf16.mxu1 %v3403_v8  ;;  %v4454_v7 = vpack.c.bf16 %v1469_v6, %v1468_v5  ;;  %v1627_v5 = vld [vmem:[#allocation19] sm:$0x1] }
 0x23b   :  { %3029 = vmatmul.mubr.msk.f32.gmra.mrb[6].mxu1 %vm776_vm5, %v974_v11  ;;  %v4462_v11 = vpack.c.bf16 %v1471_v10, %v1470_v9  ;;  %v1631_v10 = vld [vmem:[#allocation20] sm:$0x1] }
 0x23d   :  { %3406 = vmatpush3.bf16.msra.mxu1 %v3403_v8  ;;  %v4016_v8 = vmov 0.0|0.0  }
 0x23e   :  { %3408 = vmatprep.subr.bf16.mxu1 %v3407_v12  ;;  %3447 = vmatprep.subr.bf16.mxu0 %v4016_v8 }
 0x23f   :  { %3449 = vmatpush3.bf16.msra.mxu0 %v4454_v7 }
 0x240   :  { %3450 = vmatprep.subr.bf16.mxu0 %v4016_v8 }
 0x241   :  { %3410 = vmatpush3.bf16.msra.mxu1 %v3407_v12  ;;  %v1472_v12 = vld [vmem:[#allocation28 + $0x20] sm:$0xff] }
 0x242   :  { %3412 = vmatprep.subr.bf16.mxu1 %v3411_v15  ;;  %v4468_v14 = vpack.c.bf16 %v1473_v13, %v1472_v12 }
 0x243   :  { %3452 = vmatpush3.bf16.msra.mxu0 %v4462_v11 }
 0x244   :  { %3453 = vmatprep.subr.bf16.mxu0 %v4016_v8 }
 0x245   :  { %3414 = vmatpush3.bf16.msra.mxu1 %v3411_v15  ;;  %v1474_v15 = vld [vmem:[#allocation28 + $0x30] sm:$0xff] }
 0x246   :  { %3047 = vmatprep.subr.mxu1 %v1112_v16 }
 0x247   :  { %3455 = vmatpush3.bf16.msra.mxu0 %v4468_v14 }
 0x248   :  { %3456 = vmatprep.subr.bf16.mxu0 %v4016_v8 }
 0x249   :  { %3048 = vmatpush3.msra.mxu1 %v1112_v16  ;;  %v1475_v16 = vld [vmem:[#allocation28 + $0x38] sm:$0xff] }
 0x24a   :  { %3416 = vmatprep.subr.bf16.mxu1 %v3415_v20  ;;  %v4474_v17 = vpack.c.bf16 %v1475_v16, %v1474_v15  ;;  %v1855_v15 = vld [vmem:[#allocation22 + $0x48] sm:$0xff]  ;;  %v1856_v16 = vld [vmem:[#allocation22 + $0x50] sm:$0xff] }
 0x24c   :  { %3458 = vmatpush3.bf16.msra.mxu0 %v4474_v17 }
 0x24d   :  { %3459 = vmatprep.subr.bf16.mxu0 %v4016_v8 }
 0x307   :  { %v2955_v22 = vpop.f32.mrb[4].mxu0 }
 0x308   :  { %v674_v23 = vadd.f32 %v2955_v22, %v2587_v21  ;;  %v647_v24 = vpop.f32.mrb[5].mxu0 }
 0x309   :  { %v673_v25 = vadd.f32 %v2587_v21, %v647_v24 }
 0x30a   :  { %735 = vrot.lane.b32.xlu1 %v674_v23, %s4014_s15 }
 0x30b   :  { %733 = vrot.lane.b32.xlu0 %v673_v25, %s4014_s15  ;;  %v2958_v26 = vpop.f32.mrb[6].mxu0 }
 0x30c   :  { %v676_v27 = vadd.f32 %v2958_v26, %v2587_v21  ;;  %v657_v28 = vpop.f32.mrb[7].mxu0 }
 0x30d   :  { %v675_v29 = vadd.f32 %v2587_v21, %v657_v28 }
 0x30e   :  { %739 = vrot.lane.b32.xlu1 %v676_v27, %s4014_s15 }
 0x30f   :  { %737 = vrot.lane.b32.xlu0 %v675_v29, %s4014_s15 }
 0x37c   :  { %v736_v30 = vpop.permute.xlu1 %735 }
 0x37d   :  { %746 = vst.msk [vmem:[#allocation3 + $0x9] sm:$0xff] %vm712_vm3, %v736_v30  ;;  %v734_v31 = vpop.permute.xlu0 %733 }
 0x37e   :  { %745 = vst.msk [vmem:[#allocation3 + $0x1] sm:$0xff] %vm712_vm3, %v734_v31 }
 0x380   :  { %v740_v32 = vpop.permute.xlu1 %739 }
 0x381   :  { %748 = vst.msk [vmem:[#allocation3 + $0x21] sm:$0xff] %vm712_vm3, %v740_v32  ;;  %v738_v33 = vpop.permute.xlu0 %737 }
 0x382   :  { %747 = vst.msk [vmem:[#allocation3 + $0x19] sm:$0xff] %vm712_vm3, %v738_v33 }
 0x384   :  { %v1100_v38 = vld [vmem:[#allocation3 + $0x9] sm:$0xff] }
 0x385   :  { %v1099_v36 = vld [vmem:[#allocation3 + $0x1] sm:$0xff]  ;;  %v1308_v2 = vld [vmem:[#allocation3 + $0xa] sm:$0xff] }
 0x386   :  { %3049 = vmatprep.mubr.msk.f32.mxu1 %vm776_vm5, %v1099_v36  ;;  %v1086_v46 = vld [vmem:[#allocation3] sm:$0xff]  ;;  %v1087_v55 = vld [vmem:[#allocation3 + $0x8] sm:$0xff] }
 0x387   :  { %3050 = vmatmul.mubr.msk.f32.vlgmr.msra.gmra.mrb[4].mxu1 %vm776_vm5, %v1100_v38  ;;  %v1307_v63 = vld [vmem:[#allocation3 + $0x2] sm:$0xff] }
 0x388   :  { %3418 = vmatpush3.bf16.msra.mxu1 %v3415_v20  ;;  %v1102_v43 = vld [vmem:[#allocation3 + $0x21] sm:$0xff] }
 0x389   :  { %v1101_v41 = vld [vmem:[#allocation3 + $0x19] sm:$0xff]  ;;  %3420 = vmatprep.subr.bf16.mxu1 %v3419_v37  ;;  %v1310_v4 = vld [vmem:[#allocation3 + $0x22] sm:$0xff] }
 0x38a   :  { %3052 = vmatprep.mubr.msk.f32.mxu1 %vm776_vm5, %v1101_v41  ;;  %v1088_v58 = vld [vmem:[#allocation3 + $0x18] sm:$0xff]  ;;  %v1089_v60 = vld [vmem:[#allocation3 + $0x20] sm:$0xff] }
 0x38b   :  { %3053 = vmatmul.mubr.msk.f32.gmra.mrb[6].mxu1 %vm776_vm5, %v1102_v43  ;;  %v1309_v3 = vld [vmem:[#allocation3 + $0x1a] sm:$0xff] }
 0x38c   :  { %3422 = vmatpush3.bf16.msra.mxu1 %v3419_v37  ;;  %3073 = vmatprep.mubr.msk.f32.mxu1 %vm776_vm5, %v1086_v46 }
 0x38d   :  { %3424 = vmatprep.subr.bf16.mxu1 %v3423_v42 }
 0x390   :  { %3426 = vmatpush3.bf16.msra.mxu1 %v3423_v42 }
 0x391   :  { %3428 = vmatprep.subr.bf16.mxu1 %v3427_v47 }
 0x394   :  { %3430 = vmatpush3.bf16.msra.mxu1 %v3427_v47 }
 0x395   :  { %3071 = vmatprep.subr.mxu1 %v1098_v48 }
 0x398   :  { %3072 = vmatpush3.msra.mxu1 %v1098_v48 }
 0x399   :  { %3074 = vmatmul.mubr.msk.f32.vlgmr.msra.gmra.mrb[4].mxu1 %vm776_vm5, %v1087_v55  ;;  %3432 = vmatprep.subr.bf16.mxu1 %v3431_v53 }
 0x39a   :  { %3076 = vmatprep.mubr.msk.f32.mxu1 %vm776_vm5, %v1088_v58  ;;  %3434 = vmatpush3.bf16.msra.mxu1 %v3431_v53  ;;  %v1634_v58 = vld [vmem:[#allocation29] sm:$0xf] }
 0x39b   :  { %3436 = vmatprep.subr.bf16.mxu1 %v3435_v54 }
 0x39d   :  { %3077 = vmatmul.mubr.msk.f32.gmra.mrb[6].mxu1 %vm776_vm5, %v1089_v60 }
 0x39e   :  { %3438 = vmatpush3.bf16.msra.mxu1 %v3435_v54  ;;  %3097 = vmatprep.mubr.msk.f32.mxu1 %vm776_vm5, %v1307_v63 }
 0x39f   :  { %3440 = vmatprep.subr.bf16.mxu1 %v3439_v59 }
 0x3a2   :  { %3442 = vmatpush3.bf16.msra.mxu1 %v3439_v59 }
 0x3a3   :  { %3444 = vmatprep.subr.bf16.mxu1 %v3443_v0 }
 0x3a6   :  { %3446 = vmatpush3.bf16.msra.mxu1 %v3443_v0 }
 0x3a7   :  { %3095 = vmatprep.subr.mxu1 %v1320_v1 }
 0x3aa   :  { %3096 = vmatpush3.msra.mxu1 %v1320_v1 }
 0x3ab   :  { %3098 = vmatmul.mubr.msk.f32.vlgmr.msra.gmra.mrb[4].mxu1 %vm776_vm5, %v1308_v2  ;;  %3519 = vmatprep.subr.bf16.mxu1 %v4016_v8 }
 0x3ac   :  { %3100 = vmatprep.mubr.msk.f32.mxu1 %vm776_vm5, %v1309_v3  ;;  %3521 = vmatpush3.bf16.msra.mxu1 %v4454_v7 }
 0x3ad   :  { %3522 = vmatprep.subr.bf16.mxu1 %v4016_v8 }
 0x3af   :  { %3101 = vmatmul.mubr.msk.f32.gmra.mrb[6].mxu1 %vm776_vm5, %v1310_v4 }
 0x3b0   :  { %3524 = vmatpush3.bf16.msra.mxu1 %v4462_v11  ;;  %3239 = vmatprep.mubr.msk.f32.mxu1 %vm4017_vm6, %v4015_v19 }
 0x3b1   :  { %3525 = vmatprep.subr.bf16.mxu1 %v4016_v8 }
 0x3b4   :  { %3527 = vmatpush3.bf16.msra.mxu1 %v4468_v14 }
 0x3b5   :  { %3528 = vmatprep.subr.bf16.mxu1 %v4016_v8 }
 0x3b8   :  { %3530 = vmatpush3.bf16.msra.mxu1 %v4474_v17 }
 0x3b9   :  { %3261 = vmatprep.subr.mxu1 %v4015_v19 }
 0x47e   :  { %v3099_v20 = vpop.f32.mrb[4].mxu1 }
 0x47f   :  { %v4484_v21 = vadd.f32 %v3099_v20, %v2612_v18  ;;  %v1399_v22 = vpop.f32.mrb[5].mxu1  ;;  %v3471_v20 = vpack.c.bf16 %v1856_v16, %v1855_v15  ;;  %v2065_v15 = vld [vmem:[#allocation22 + $0xa0] sm:$0xff]  ;;  %v2066_v16 = vld [vmem:[#allocation22 + $0xa8] sm:$0xff] }
 0x480   :  { %v4486_v23 = vadd.f32 %v2612_v18, %v1399_v22  ;;  %v1858_v22 = vld [vmem:[#allocation22 + $0x60] sm:$0xff] }
 0x481   :  { %v1452_v24 = vmul.f32 %v4484_v21, %v4484_v21  ;;  %v1439_v25 = vsel %vm1437_vm7, %v4484_v21, 0.0 }
 0x482   :  { %v1438_v26 = vsel %vm1437_vm7, %v4486_v23, 0.0  ;;  %v1451_v27 = vmul.f32 %v4486_v23, %v4486_v23  ;;  %v3102_v28 = vpop.f32.mrb[6].mxu1 }
 0x483   :  { %v1409_v29 = vpop.f32.mrb[7].mxu1  ;;  %v1456_v30 = vsel %vm1437_vm7, %v1452_v24, 0.0  ;;  %v4498_v32 = vadd.f32 %v3102_v28, %v2612_v18  ;;  %v1440_v34 = vadd.f32 %v1439_v25, %v1438_v26  ;;  %v1859_v25 = vld [vmem:[#allocation22 + $0x68] sm:$0xff]  ;;  %v1860_v26 = vld [vmem:[#allocation22 + $0x70] sm:$0xff]  ;;  %v1785_v28 = vlaneseq }
 0x484   :  { %v1455_v31 = vsel %vm1437_vm7, %v1451_v27, 0.0  ;;  %v4500_v33 = vadd.f32 %v2612_v18, %v1409_v29  ;;  %v1857_v18 = vld [vmem:[#allocation22 + $0x58] sm:$0xff]  ;;  %v3479_v27 = vpack.c.bf16 %v1860_v26, %v1859_v25 }
 0x485   :  { %v1457_v37 = vadd.f32 %v1456_v30, %v1455_v31  ;;  %v1443_v39 = vsel %vm1437_vm7, %v4498_v32, 0.0  ;;  %v1454_v40 = vmul.f32 %v4498_v32, %v4498_v32  ;;  %v3475_v24 = vpack.c.bf16 %v1858_v22, %v1857_v18  ;;  %v1861_v31 = vld [vmem:[#allocation22 + $0x78] sm:$0xff] }
 0x486   :  { %v1441_v35 = vsel %vm1437_vm7, %v4500_v33, 0.0  ;;  %v1453_v36 = vmul.f32 %v4500_v33, %v4500_v33  ;;  %v1786_v29 = vshrl.u32 %v1785_v28, 7  ;;  %v2068_v25 = vld [vmem:[#allocation22 + $0xb8] sm:$0xff] }
 0x487   :  { %v1442_v38 = vadd.f32 %v1441_v35, %v1440_v34  ;;  %v1460_v45 = vsel %vm1437_vm7, %v1454_v40, 0.0  ;;  %v1862_v34 = vld [vmem:[#allocation22 + $0x80] sm:$0xff] }
 0x488   :  { %v1458_v41 = vsel %vm1437_vm7, %v1453_v36, 0.0  ;;  %v4533_v30 = vsub.s32 0, %v1786_v29  ;;  %v3483_v35 = vpack.c.bf16 %v1862_v34, %v1861_v31  ;;  %v1841_v40 = vld [vmem:[#allocation22] sm:$0xff]  ;;  %v2070_v31 = vld [vmem:[#allocation22 + $0xc8] sm:$0xff] }
 0x489   :  { %v1444_v42 = vadd.f32 %v1443_v39, %v1442_v38  ;;  %v1459_v43 = vadd.f32 %v1458_v41, %v1457_v37  ;;  %v1863_v39 = vld [vmem:[#allocation22 + $0x88] sm:$0xff]  ;;  %v2069_v29 = vld [vmem:[#allocation22 + $0xc0] sm:$0xff] }
 0x48a   :  { %v1842_v41 = vld [vmem:[#allocation22 + $0x8] sm:$0xff] }
 0x48b   :  { %v1445_v44 = vrot.slane %v1444_v42, 4  ;;  %v1461_v47 = vadd.f32 %v1460_v45, %v1459_v43 }
 0x48d   :  { %v1446_v46 = vadd.f32 %v1445_v44, %v1444_v42  ;;  %v1462_v50 = vrot.slane %v1461_v47, 4  ;;  %v3487_v44 = vpack.c.bf16 %v1842_v41, %v1841_v40 }
 0x48f   :  { %v1447_v48 = vrot.slane %v1446_v46, 2  ;;  %v1463_v53 = vadd.f32 %v1462_v50, %v1461_v47 }
 0x491   :  { %v1448_v49 = vadd.f32 %v1447_v48, %v1446_v46  ;;  %v1464_v54 = vrot.slane %v1463_v53, 2 }
 0x493   :  { %v1449_v51 = vrot.slane %v1448_v49, 1  ;;  %v1465_v55 = vadd.f32 %v1464_v54, %v1463_v53 }
 0x495   :  { %v1450_v52 = vadd.f32 %v1449_v51, %v1448_v49  ;;  %v1466_v56 = vrot.slane %v1465_v55, 1 }
 0x497   :  { %3120 = vmatmul.mubr.msk.f32.vlgmr.msra.gmra.mrb[8].mxu0 %vm1437_vm7, %v1450_v52  ;;  %v1467_v57 = vadd.f32 %v1466_v56, %v1465_v55 }
 0x498   :  { %3461 = vmatpush3.bf16.msra.mxu0 %v4454_v7  ;;  %3138 = vmatprep.mubr.msk.f32.mxu0 %vm4017_vm6, %v4015_v19 }
 0x499   :  { %3462 = vmatprep.subr.bf16.mxu0 %v4016_v8 }
 0x49c   :  { %3464 = vmatpush3.bf16.msra.mxu0 %v4462_v11 }
 0x49d   :  { %3465 = vmatprep.subr.bf16.mxu0 %v4016_v8 }
 0x4a0   :  { %3467 = vmatpush3.bf16.msra.mxu0 %v4468_v14 }
 0x4a1   :  { %3468 = vmatprep.subr.bf16.mxu0 %v4016_v8 }
 0x4a4   :  { %3470 = vmatpush3.bf16.msra.mxu0 %v4474_v17 }
 0x4a5   :  { %3141 = vmatprep.subr.mxu0 %v4015_v19 }
 0x4a7   :  { %3139 = vmatmul.mubr.msk.f32.vlgmr.msra.gmra.mrb[10].mxu0 %vm1437_vm7, %v1467_v57 }
 0x4a8   :  { %3143 = vmatprep.mubr.msk.f32.mxu0 %vm4017_vm6, %v4015_v19  ;;  %3142 = vmatpush3.msk.msra.mxu0 %vm1638_vm8, %v1634_v58 }
 0x4a9   :  { %3146 = vmatprep.subr.mxu0 %v4015_v19 }
 0x56a   :  { %v1545_v59 = vpop.f32.mrb[8].mxu0 }
 0x56b   :  { %v3121_v60 = vpop.f32.mrb[9].mxu0  ;;  %v1549_v61 = vmul.f32 0.001953125, %v1545_v59  ;;  %v1844_v59 = vld [vmem:[#allocation22 + $0x18] sm:$0xff] }
 0x56d   :  { %v1624_v63 = vmul.f32 %v1549_v61, %v1549_v61 }
 0x57a   :  { %v1619_v62 = vpop.f32.mrb[10].mxu0 }
 0x57b   :  { %v1623_v0 = vmul.f32 0.001953125, %v1619_v62  ;;  %v3140_v1 = vpop.f32.mrb[11].mxu0 }
 0x57d   :  { %v1625_v2 = vsub.f32 %v1623_v0, %v1624_v63  ;;  %v1845_v63 = vld [vmem:[#allocation22 + $0x20] sm:$0xff]  ;;  %v1846_v0 = vld [vmem:[#allocation22 + $0x28] sm:$0xff] }
 0x57f   :  { %v1626_v3 = vmax.f32 %v1625_v2, 0.0 }
 0x581   :  { %v1628_v4 = vadd.f32 1e-05, %v1626_v3  ;;  %v3495_v3 = vpack.c.bf16 %v1846_v0, %v1845_v63 }
 0x583   :  { %3598 = vrsqrt.f32 %v1628_v4  ;;  %v1847_v4 = vld [vmem:[#allocation22 + $0x30] sm:$0xff] }
 0x58d   :  { %v3599_v6 = vpop.eup %3598 }
 0x58e   :  { %v1630_v9 = vmul.f32 %v3599_v6, %v1627_v5  ;;  %v1848_v5 = vld [vmem:[#allocation22 + $0x38] sm:$0xff] }
 0x590   :  { %3144 = vmatmul.mubr.msk.f32.vlgmr.msra.gmra.mrb[12].mxu0 %vm682_vm1, %v1630_v9  ;;  %v1632_v12 = vmul.f32 %v1630_v9, %v1549_v61  ;;  %v3499_v9 = vpack.c.bf16 %v1848_v5, %v1847_v4 }
 0x591   :  { %3147 = vmatpush3.msk.msra.mxu0 %vm1638_vm8, %v1634_v58  ;;  %3148 = vmatprep.mubr.msk.f32.mxu0 %vm4017_vm6, %v4015_v19  ;;  %v1843_v58 = vld [vmem:[#allocation22 + $0x10] sm:$0xff] }
 0x592   :  { %v1633_v13 = vsub.f32 %v1631_v10, %v1632_v12  ;;  %3472 = vmatprep.subr.bf16.mxu0 %v3471_v20  ;;  %v3491_v62 = vpack.c.bf16 %v1844_v59, %v1843_v58  ;;  %v1849_v10 = vld [vmem:[#allocation22 + $0x40] sm:$0xff]  ;;  %v2063_v12 = vld [vmem:[#allocation22 + $0x90] sm:$0xff] }
 0x594   :  { %3149 = vmatmul.mubr.msk.f32.vlgmr.msra.gmra.mrb[14].mxu0 %vm682_vm1, %v1633_v13  ;;  %v2064_v13 = vld [vmem:[#allocation22 + $0x98] sm:$0xff] }
 0x595   :  { %3474 = vmatpush3.bf16.msra.mxu0 %v3471_v20  ;;  %v3503_v18 = vpack.c.bf16 %v2064_v13, %v2063_v12  ;;  %v3507_v20 = vpack.c.bf16 %v2066_v16, %v2065_v15 }
 0x596   :  { %3476 = vmatprep.subr.bf16.mxu0 %v3475_v24 }
 0x599   :  { %3478 = vmatpush3.bf16.msra.mxu0 %v3475_v24  ;;  %v2067_v24 = vld [vmem:[#allocation22 + $0xb0] sm:$0xff] }
 0x59a   :  { %3480 = vmatprep.subr.bf16.mxu0 %v3479_v27 }
 0x59d   :  { %3482 = vmatpush3.bf16.msra.mxu0 %v3479_v27  ;;  %v3511_v27 = vpack.c.bf16 %v2068_v25, %v2067_v24  ;;  %v2373_v25 = vld [vmem:[#allocation25] sm:$0x1] }
 0x59e   :  { %3484 = vmatprep.subr.bf16.mxu0 %v3483_v35 }
 0x5a1   :  { %3486 = vmatpush3.bf16.msra.mxu0 %v3483_v35  ;;  %v3515_v35 = vpack.c.bf16 %v2070_v31, %v2069_v29 }
 0x5a2   :  { %3167 = vmatprep.subr.mxu0 %v1863_v39 }
 0x5a5   :  { %3168 = vmatpush3.msra.mxu0 %v1863_v39 }
 0x5a6   :  { %3488 = vmatprep.subr.bf16.mxu0 %v3487_v44 }
 0x663   :  { %v1708_v36 = vpop.f32.mrb[12].mxu0 }
 0x664   :  { %v1788_v37 = vrot.slane %v1708_v36, %v4533_v30  ;;  %v3145_v38 = vpop.f32.mrb[13].mxu0  ;;  %v2071_v36 = vld [vmem:[#allocation22 + $0xd0] sm:$0xff] }
 0x666   :  { %v1790_v43 = vmul.f32 %v1788_v37, %v4484_v21  ;;  %v1789_v47 = vmul.f32 %v1788_v37, %v4486_v23  ;;  %v1792_v48 = vmul.f32 %v1788_v37, %v4498_v32  ;;  %v1791_v49 = vmul.f32 %v1788_v37, %v4500_v33 }
 0x667   :  { %v1781_v42 = vpop.f32.mrb[14].mxu0 }
 0x668   :  { %v1796_v45 = vrot.slane %v1781_v42, %v4533_v30  ;;  %v3150_v46 = vpop.f32.mrb[15].mxu0 }
 0x66a   :  { %v1798_v50 = vadd.f32 %v1796_v45, %v1790_v43  ;;  %v1797_v51 = vadd.f32 %v1796_v45, %v1789_v47  ;;  %v1800_v52 = vadd.f32 %v1796_v45, %v1792_v48  ;;  %v1799_v53 = vadd.f32 %v1796_v45, %v1791_v49 }
 0x66c   :  { %v1802_v54 = vmax.f32 %v1798_v50, 0.0  ;;  %v1801_v55 = vmax.f32 %v1797_v51, 0.0  ;;  %v1804_v21 = vmax.f32 %v1800_v52, 0.0  ;;  %v1803_v56 = vmax.f32 %v1799_v53, 0.0 }
 0x66e   :  { %1823 = vrot.lane.b32.xlu1 %v1802_v54, %s4014_s15  ;;  %1821 = vrot.lane.b32.xlu0 %v1801_v55, %s4014_s15 }
 0x672   :  { %1827 = vrot.lane.b32.xlu1 %v1804_v21, %s4014_s15  ;;  %1825 = vrot.lane.b32.xlu0 %v1803_v56, %s4014_s15 }
 0x6e0   :  { %v1824_v23 = vpop.permute.xlu1 %1823  ;;  %v1822_v32 = vpop.permute.xlu0 %1821 }
 0x6e1   :  { %1834 = vst.msk [vmem:[#allocation4 + $0x9] sm:$0xff] %vm712_vm3, %v1824_v23  ;;  %1833 = vst.msk [vmem:[#allocation4 + $0x1] sm:$0xff] %vm712_vm3, %v1822_v32 }
 0x6e4   :  { %v1828_v33 = vpop.permute.xlu1 %1827  ;;  %v1826_v57 = vpop.permute.xlu0 %1825 }
 0x6e5   :  { %1836 = vst.msk [vmem:[#allocation4 + $0x21] sm:$0xff] %vm712_vm3, %v1828_v33  ;;  %1835 = vst.msk [vmem:[#allocation4 + $0x19] sm:$0xff] %vm712_vm3, %v1826_v57 }
 0x6e8   :  { %v1850_v60 = vld [vmem:[#allocation4 + $0x1] sm:$0xff]  ;;  %v1851_v61 = vld [vmem:[#allocation4 + $0x9] sm:$0xff] }
 0x6e9   :  { %3169 = vmatprep.mubr.msk.f32.mxu0 %vm776_vm5, %v1850_v60  ;;  %v1837_v6 = vld [vmem:[#allocation4] sm:$0xff]  ;;  %v1838_v22 = vld [vmem:[#allocation4 + $0x8] sm:$0xff] }
 0x6ea   :  { %3170 = vmatmul.mubr.msk.f32.vlgmr.msra.gmra.mrb[16].mxu0 %vm776_vm5, %v1851_v61  ;;  %v2058_v34 = vld [vmem:[#allocation4 + $0x2] sm:$0xff]  ;;  %v2059_v37 = vld [vmem:[#allocation4 + $0xa] sm:$0xff] }
 0x6eb   :  { %3490 = vmatpush3.bf16.msra.mxu0 %v3487_v44 }
 0x6ec   :  { %v1852_v1 = vld [vmem:[#allocation4 + $0x19] sm:$0xff]  ;;  %3492 = vmatprep.subr.bf16.mxu0 %v3491_v62  ;;  %v1853_v2 = vld [vmem:[#allocation4 + $0x21] sm:$0xff] }
 0x6ed   :  { %3172 = vmatprep.mubr.msk.f32.mxu0 %vm776_vm5, %v1852_v1  ;;  %v1839_v26 = vld [vmem:[#allocation4 + $0x18] sm:$0xff]  ;;  %v1840_v28 = vld [vmem:[#allocation4 + $0x20] sm:$0xff] }
 0x6ee   :  { %3173 = vmatmul.mubr.msk.f32.gmra.mrb[18].mxu0 %vm776_vm5, %v1853_v2  ;;  %v2060_v38 = vld [vmem:[#allocation4 + $0x1a] sm:$0xff]  ;;  %v2061_v39 = vld [vmem:[#allocation4 + $0x22] sm:$0xff] }
 0x6ef   :  { %3494 = vmatpush3.bf16.msra.mxu0 %v3491_v62  ;;  %3193 = vmatprep.mubr.msk.f32.mxu0 %vm776_vm5, %v1837_v6  ;;  %v2380_v6 = vld [vmem:[#allocation29] sm:$0xf] }
 0x6f0   :  { %3496 = vmatprep.subr.bf16.mxu0 %v3495_v3 }
 0x6f3   :  { %3498 = vmatpush3.bf16.msra.mxu0 %v3495_v3 }
 0x6f4   :  { %3500 = vmatprep.subr.bf16.mxu0 %v3499_v9 }
 0x6f7   :  { %3502 = vmatpush3.bf16.msra.mxu0 %v3499_v9 }
 0x6f8   :  { %3191 = vmatprep.subr.mxu0 %v1849_v10 }
 0x6fb   :  { %3192 = vmatpush3.msra.mxu0 %v1849_v10 }
 0x6fc   :  { %3194 = vmatmul.mubr.msk.f32.vlgmr.msra.gmra.mrb[16].mxu0 %vm776_vm5, %v1838_v22  ;;  %3504 = vmatprep.subr.bf16.mxu0 %v3503_v18 }
 0x6fd   :  { %3196 = vmatprep.mubr.msk.f32.mxu0 %vm776_vm5, %v1839_v26  ;;  %3506 = vmatpush3.bf16.msra.mxu0 %v3503_v18 }
 0x6fe   :  { %3508 = vmatprep.subr.bf16.mxu0 %v3507_v20 }
 0x700   :  { %3197 = vmatmul.mubr.msk.f32.gmra.mrb[18].mxu0 %vm776_vm5, %v1840_v28 }
 0x701   :  { %3510 = vmatpush3.bf16.msra.mxu0 %v3507_v20  ;;  %3217 = vmatprep.mubr.msk.f32.mxu0 %vm776_vm5, %v2058_v34 }
 0x702   :  { %3512 = vmatprep.subr.bf16.mxu0 %v3511_v27 }
 0x705   :  { %3514 = vmatpush3.bf16.msra.mxu0 %v3511_v27 }
 0x706   :  { %3516 = vmatprep.subr.bf16.mxu0 %v3515_v35 }
 0x709   :  { %3518 = vmatpush3.bf16.msra.mxu0 %v3515_v35 }
 0x70a   :  { %3215 = vmatprep.subr.mxu0 %v2071_v36 }
 0x70d   :  { %3216 = vmatpush3.msra.mxu0 %v2071_v36 }
 0x70e   :  { %3218 = vmatmul.mubr.msk.f32.vlgmr.msra.gmra.mrb[16].mxu0 %vm776_vm5, %v2059_v37  ;;  %3531 = vmatprep.subr.bf16.mxu0 %v4016_v8 }
 0x70f   :  { %3220 = vmatprep.mubr.msk.f32.mxu0 %vm776_vm5, %v2060_v38  ;;  %3533 = vmatpush3.bf16.msra.mxu0 %v4454_v7  ;;  %v2631_v7 = vld [vmem:[#allocation23] ss:$0 sm:$0xff] }
 0x710   :  { %3534 = vmatprep.subr.bf16.mxu0 %v4016_v8 }
 0x712   :  { %3221 = vmatmul.mubr.msk.f32.gmra.mrb[18].mxu0 %vm776_vm5, %v2061_v39 }
 0x713   :  { %3536 = vmatpush3.bf16.msra.mxu0 %v4462_v11  ;;  %3258 = vmatprep.mubr.msk.f32.mxu0 %vm4017_vm6, %v4015_v19 }
 0x714   :  { %3537 = vmatprep.subr.bf16.mxu0 %v4016_v8 }
 0x717   :  { %3539 = vmatpush3.bf16.msra.mxu0 %v4468_v14 }
 0x718   :  { %3540 = vmatprep.subr.bf16.mxu0 %v4016_v8 }
 0x71b   :  { %3542 = vmatpush3.bf16.msra.mxu0 %v4474_v17 }
 0x71c   :  { %3266 = vmatprep.subr.mxu0 %v4015_v19 }
 0x7e1   :  { %v3219_v40 = vpop.f32.mrb[16].mxu0 }
 0x7e2   :  { %v4572_v41 = vadd.f32 %v3219_v40, %v2631_v7  ;;  %v2150_v42 = vpop.f32.mrb[17].mxu0 }
 0x7e3   :  { %v4574_v43 = vadd.f32 %v2631_v7, %v2150_v42 }
 0x7e4   :  { %v2198_v11 = vmul.f32 %v4572_v41, %v4572_v41  ;;  %v2185_v44 = vsel %vm1437_vm7, %v4572_v41, 0.0 }
 0x7e5   :  { %v2184_v8 = vsel %vm1437_vm7, %v4574_v43, 0.0  ;;  %v2197_v14 = vmul.f32 %v4574_v43, %v4574_v43  ;;  %v3222_v17 = vpop.f32.mrb[18].mxu0 }
 0x7e6   :  { %v2183_v45 = vadd.f32 %v3222_v17, %v2631_v7  ;;  %v2160_v46 = vpop.f32.mrb[19].mxu0  ;;  %v2202_v47 = vsel %vm1437_vm7, %v2198_v11, 0.0  ;;  %v2186_v50 = vadd.f32 %v2185_v44, %v2184_v8 }
 0x7e7   :  { %v2201_v48 = vsel %vm1437_vm7, %v2197_v14, 0.0  ;;  %v2182_v49 = vadd.f32 %v2631_v7, %v2160_v46 }
 0x7e8   :  { %v2200_v51 = vmul.f32 %v2183_v45, %v2183_v45  ;;  %v2203_v54 = vadd.f32 %v2202_v47, %v2201_v48  ;;  %v2189_v21 = vsel %vm1437_vm7, %v2183_v45, 0.0 }
 0x7e9   :  { %v2187_v52 = vsel %vm1437_vm7, %v2182_v49, 0.0  ;;  %v2199_v53 = vmul.f32 %v2182_v49, %v2182_v49 }
 0x7ea   :  { %v2188_v55 = vadd.f32 %v2187_v52, %v2186_v50  ;;  %v2206_v33 = vsel %vm1437_vm7, %v2200_v51, 0.0 }
 0x7eb   :  { %v2204_v56 = vsel %vm1437_vm7, %v2199_v53, 0.0 }
 0x7ec   :  { %v2190_v23 = vadd.f32 %v2189_v21, %v2188_v55  ;;  %v2205_v32 = vadd.f32 %v2204_v56, %v2203_v54 }
 0x7ee   :  { %v2191_v57 = vrot.slane %v2190_v23, 4  ;;  %v2207_v58 = vadd.f32 %v2206_v33, %v2205_v32 }
 0x7f0   :  { %v2192_v59 = vadd.f32 %v2191_v57, %v2190_v23  ;;  %v2208_v60 = vrot.slane %v2207_v58, 4 }
 0x7f2   :  { %v2193_v61 = vrot.slane %v2192_v59, 2  ;;  %v2209_v62 = vadd.f32 %v2208_v60, %v2207_v58 }
 0x7f4   :  { %v2194_v63 = vadd.f32 %v2193_v61, %v2192_v59  ;;  %v2210_v0 = vrot.slane %v2209_v62, 2 }
 0x7f6   :  { %v2195_v1 = vrot.slane %v2194_v63, 1  ;;  %v2211_v2 = vadd.f32 %v2210_v0, %v2209_v62 }
 0x7f8   :  { %v2196_v3 = vadd.f32 %v2195_v1, %v2194_v63  ;;  %v2212_v4 = vrot.slane %v2211_v2, 1 }
 0x7fa   :  { %v2213_v5 = vadd.f32 %v2212_v4, %v2211_v2  ;;  %3240 = vmatmul.mubr.msk.f32.vlgmr.msra.gmra.mrb[8].mxu1 %vm1437_vm7, %v2196_v3 }
 0x7fb   :  { %3263 = vmatprep.mubr.msk.f32.mxu1 %vm4017_vm6, %v4015_v19  ;;  %3262 = vmatpush3.msk.msra.mxu1 %vm1638_vm8, %v2380_v6 }
 0x7fc   :  { %3259 = vmatmul.mubr.msk.f32.vlgmr.msra.gmra.mrb[20].mxu0 %vm1437_vm7, %v2213_v5 }
 0x7fd   :  { %3268 = vmatprep.mubr.msk.f32.mxu0 %vm4017_vm6, %v4015_v19  ;;  %3267 = vmatpush3.msk.msra.mxu0 %vm1638_vm8, %v2380_v6  ;;  %v2377_v19 = vld [vmem:[#allocation26] sm:$0x1] }
 0x8cd   :  { %v2291_v9 = vpop.f32.mrb[8].mxu1 }
 0x8ce   :  { %v2295_v10 = vmul.f32 0.001953125, %v2291_v9  ;;  %v3241_v12 = vpop.f32.mrb[9].mxu1 }
 0x8cf   :  { %v2365_v13 = vpop.f32.mrb[20].mxu0 }
 0x8d0   :  { %v2370_v15 = vmul.f32 %v2295_v10, %v2295_v10  ;;  %v2369_v16 = vmul.f32 0.001953125, %v2365_v13  ;;  %v3260_v18 = vpop.f32.mrb[21].mxu0 }
 0x8d2   :  { %v2371_v20 = vsub.f32 %v2369_v16, %v2370_v15 }
 0x8d4   :  { %v2372_v22 = vmax.f32 %v2371_v20, 0.0 }
 0x8d6   :  { %v2374_v24 = vadd.f32 1e-05, %v2372_v22 }
 0x8d8   :  { %3600 = vrsqrt.f32 %v2374_v24 }
 0x8e2   :  { %v3601_v26 = vpop.eup %3600 }
 0x8e3   :  { %v2376_v27 = vmul.f32 %v3601_v26, %v2373_v25 }
 0x8e5   :  { %3264 = vmatmul.mubr.msk.f32.vlgmr.msra.gmra.mrb[10].mxu1 %vm682_vm1, %v2376_v27  ;;  %v2378_v28 = vmul.f32 %v2376_v27, %v2295_v10 }
 0x8e7   :  { %v2379_v29 = vsub.f32 %v2377_v19, %v2378_v28 }
 0x8e9   :  { %3269 = vmatmul.mubr.msk.f32.vlgmr.msra.gmra.mrb[22].mxu0 %vm682_vm1, %v2379_v29 }
 0x9b8   :  { %v2453_v31 = vpop.f32.mrb[10].mxu1 }
 0x9b9   :  { %v2533_v34 = vrot.slane %v2453_v31, %v4533_v30  ;;  %v3265_v35 = vpop.f32.mrb[11].mxu1 }
 0x9bb   :  { %v2534_v36 = vmul.f32 %v2533_v34, %v4574_v43  ;;  %v2535_v38 = vmul.f32 %v2533_v34, %v4572_v41  ;;  %v2536_v39 = vmul.f32 %v2533_v34, %v2182_v49  ;;  %v2537_v7 = vmul.f32 %v2533_v34, %v2183_v45 }
 0x9bc   :  { %v2526_v37 = vpop.f32.mrb[22].mxu0 }
 0x9bd   :  { %v2541_v40 = vrot.slane %v2526_v37, %v4533_v30  ;;  %v3270_v42 = vpop.f32.mrb[23].mxu0 }
 0x9bf   :  { %v2542_v11 = vadd.f32 %v2541_v40, %v2534_v36  ;;  %v2543_v44 = vadd.f32 %v2541_v40, %v2535_v38  ;;  %v2544_v8 = vadd.f32 %v2541_v40, %v2536_v39  ;;  %v2545_v14 = vadd.f32 %v2541_v40, %v2537_v7 }
 0x9c1   :  { %v2546_v17 = vmax.f32 %v2542_v11, 0.0  ;;  %v2547_v46 = vmax.f32 %v2543_v44, 0.0  ;;  %v2548_v47 = vmax.f32 %v2544_v8, 0.0  ;;  %v2549_v48 = vmax.f32 %v2545_v14, 0.0 }
 0x9c3   :  { %2550 = vst.msk [vmem:[#allocation31] sm:$0xff] %vm1437_vm7, %v2546_v17  ;;  %2551 = vst.msk [vmem:[#allocation31 + $0x8] sm:$0xff] %vm1437_vm7, %v2547_v46 }
 0x9c4   :  { %2552 = vst.msk [vmem:[#allocation31 + $0x10] sm:$0xff] %vm1437_vm7, %v2548_v47  ;;  %2553 = vst.msk [vmem:[#allocation31 + $0x18] sm:$0xff] %vm1437_vm7, %v2549_v48 }
 0x9c5   :  { %3965 = shalt.err (!%p3962_p6)
}
 0x9c6   :  { %s3966_s3 = scalar_lea.hbm %s4639_s16, 512 }
 0x9c7   :  { %p3967_p7 = scmp.ne.s32.totalorder %s4639_s16, %s3966_s3  ;;  %p3970_p8 = scmp.lt.u32.totalorder %s3966_s3, %s4639_s16 }
 0x9c9   :  { %p3972_p9 = pnand %p3970_p8, %p3967_p7 }
 0x9cb   :  { %3975 = shalt.err (!%p3972_p9)
}
 0x9cc   :  { %2565 = dma.vmem_to_hbm [thread:$0]  %s2560_s10, 512, %s4639_s16, [#allocation7], %s3998_s18, %s3998_s18, %s3999_s19  }
 0x9cd   :  { %3994 = dma.done.wait [#allocation7], 512  }
 0x9ce   :  { %3995 = vsyncadd [#allocation7], 4294966784 }
 0x9cf   :  { %2569 = vsyncpa [#allocation6], 1 }
 0x9d0   :  { %2570 = vsyncpa [#allocation9], 1 }
 0x9d1   :  { %2571 = vsyncpa [#allocation12], 1 }
 0x9d2   :  { %2572 = vsyncpa [#allocation15], 1 }
 0x9d3   :  { %2573 = vsyncpa [#allocation18], 1 }
 0x9d4   :  { %2574 = vsyncpa [#allocation21], 1 }
 0x9d5   :  { %2575 = vsyncpa [#allocation24], 1 }
 0x9d6   :  { %2576 = vsyncpa [#allocation27], 1 }
 0x9d7   :  { %2577 = vsyncpa [#allocation30], 1 }
 0x9d8   :  { %2578 = vsyncpa [#allocation7], 1 }

</bundles_post_ra>
